<compile_context>
chip_gen: v7x
topology: tpu7x:2x2x1
jax: 0.10.0
libtpu: 0.0.40
codegen_flags: <defaults>
</compile_context>

<pallas_src>
import jax
import jax.numpy as jnp
from jax.experimental import pallas as pl
from jax.experimental.pallas import tpu as pltpu

IN_FEATURES = 1024
OUT_FEATURES = 768
DROP_P = 0.5


def _generator_eval_kernel(x_ref, w_ref, b_ref, o_ref):
    """out = tanh(x @ w + b) for one output-column tile."""
    acc = jnp.dot(x_ref[...], w_ref[...], preferred_element_type=jnp.float32)
    o_ref[...] = jnp.tanh(acc + b_ref[...]).astype(o_ref.dtype)


def _generator_train_kernel(x_ref, w_ref, b_ref, m_ref, o_ref):
    """out = mask * tanh(x @ w + b); mask is pre-scaled by 1/(1-p)."""
    acc = jnp.dot(x_ref[...], w_ref[...], preferred_element_type=jnp.float32)
    o_ref[...] = (jnp.tanh(acc + b_ref[...]) * m_ref[...]).astype(o_ref.dtype)


def generator_forward(x, w, b, *, training, dropout_key=None, tn=OUT_FEATURES):
    """x: (B, 1024), w: (1024, 768), b: (768,) -> (B, 768) f32."""
    B, K = x.shape
    K2, N = w.shape
    assert K == K2 == IN_FEATURES and N == OUT_FEATURES
    assert N % tn == 0

    # Stream matmul operands as bf16 (halves weight HBM bytes); accumulate f32.
    x_lo = x.astype(jnp.bfloat16)
    w_lo = w.astype(jnp.bfloat16)
    b2d = b.reshape(1, N).astype(jnp.float32)

    in_specs = [
        pl.BlockSpec((B, K), lambda j: (0, 0)),
        pl.BlockSpec((K, tn), lambda j: (0, j)),
        pl.BlockSpec((1, tn), lambda j: (0, j)),
    ]
    operands = [x_lo, w_lo, b2d]

    if training:
        assert dropout_key is not None
        # TODO(synk): PyTorch's exact dropout RNG stream is not reproducible;
        # same keep-prob (0.5) and 1/(1-p) scaling, but a jax.random stream.
        keep = jax.random.bernoulli(dropout_key, 1.0 - DROP_P, (B, N))
        mask = keep.astype(jnp.float32) * (1.0 / (1.0 - DROP_P))
        in_specs.append(pl.BlockSpec((B, tn), lambda j: (0, j)))
        operands.append(mask)
        kernel = _generator_train_kernel
    else:
        kernel = _generator_eval_kernel

    return pl.pallas_call(
        kernel,
        out_shape=jax.ShapeDtypeStruct((B, N), jnp.float32),
        grid_spec=pltpu.PrefetchScalarGridSpec(
            num_scalar_prefetch=0,
            grid=(N // tn,),          # tn == N  ->  grid == (1,)
            in_specs=in_specs,
            out_specs=pl.BlockSpec((B, tn), lambda j: (0, j)),
        ),
        compiler_params=pltpu.CompilerParams(
            # Independent column tiles; lets Mosaic shard across v7x's two
            # TensorCores if a tn < N (e.g. tn=384) is ever chosen.
            dimension_semantics=("parallel",),
        ),
    )(*operands)


if __name__ == "__main__":
    key = jax.random.PRNGKey(0)
    kx, kw, kb, kd = jax.random.split(key, 4)

    B = 8  # small batch; feature dims fixed by the module (1024 -> 768)
    x = jax.random.normal(kx, (B, IN_FEATURES), dtype=jnp.float32)

    # Deterministic init mirroring nn.Linear defaults: U(-1/sqrt(in), 1/sqrt(in)).
    bound = 1.0 / jnp.sqrt(jnp.float32(IN_FEATURES))
    w = jax.random.uniform(kw, (IN_FEATURES, OUT_FEATURES), jnp.float32,
                           minval=-bound, maxval=bound)
    b = jax.random.uniform(kb, (OUT_FEATURES,), jnp.float32,
                           minval=-bound, maxval=bound)

    # Training-mode forward (dropout applied).
    y_train = generator_forward(x, w, b, training=True, dropout_key=kd)
    jax.block_until_ready(y_train)

    # Eval-mode forward (dropout disabled) -- verify against a pure-JAX
    # reference using the same bf16 operand casts as the kernel.
    y_eval = generator_forward(x, w, b, training=False)
    jax.block_until_ready(y_eval)
    y_ref = jnp.tanh(
        jnp.dot(x.astype(jnp.bfloat16), w.astype(jnp.bfloat16),
                preferred_element_type=jnp.float32) + b)
    assert y_eval.shape == (B, OUT_FEATURES)
    assert y_train.shape == (B, OUT_FEATURES)
    assert jnp.allclose(y_eval, y_ref, atol=2e-3, rtol=2e-3), "mismatch vs reference"

    print("KERNEL_OK")
</pallas_src>

<mosaic_0001>
module attributes {stable_mosaic.version = 11 : i64} {
  func.func @_generator_train_kernel(%arg0: i32, %arg1: memref<8x1024xbf16, #tpu.memory_space<vmem>>, %arg2: memref<1024x768xbf16, #tpu.memory_space<vmem>>, %arg3: memref<1x768xf32, #tpu.memory_space<vmem>>, %arg4: memref<8x768xf32, #tpu.memory_space<vmem>>, %arg5: memref<8x768xf32, #tpu.memory_space<vmem>>) attributes {dimension_semantics = [#tpu.dimension_semantics<parallel>], iteration_bounds = array<i64: 1>, scalar_prefetch = 0 : i64, scratch_operands = 0 : i64, tpu.core_type = #tpu.core_type<tc>, window_params = [{pipeline_mode = #tpu.pipeline_mode<synchronous>, transform_indices = @transform_0, window_bounds = array<i64: 8, 1024>}, {transform_indices = @transform_1, window_bounds = array<i64: 1024, 768>}, {transform_indices = @transform_2, window_bounds = array<i64: 1, 768>}, {transform_indices = @transform_3, window_bounds = array<i64: 8, 768>}, {transform_indices = @transform_4, window_bounds = array<i64: 8, 768>}]} {
    %c0 = arith.constant 0 : index
    %c0_0 = arith.constant 0 : index
    %0 = vector.load %arg1[%c0, %c0_0] : memref<8x1024xbf16, #tpu.memory_space<vmem>>, vector<8x1024xbf16>
    %c0_1 = arith.constant 0 : index
    %c0_2 = arith.constant 0 : index
    %1 = vector.load %arg2[%c0_1, %c0_2] : memref<1024x768xbf16, #tpu.memory_space<vmem>>, vector<1024x768xbf16>
    %cst = arith.constant dense<0.000000e+00> : vector<8x768xf32>
    %2 = tpu.matmul %0, %1, %cst {dimension_numbers = #tpu.dot_dimension_numbers<[1], [0], [0], [1], [0, 0, 1, 1], [], []>} : vector<8x1024xbf16>, vector<1024x768xbf16>, vector<8x768xf32> -> vector<8x768xf32>
    %c0_3 = arith.constant 0 : index
    %c0_4 = arith.constant 0 : index
    %3 = vector.load %arg3[%c0_3, %c0_4] : memref<1x768xf32, #tpu.memory_space<vmem>>, vector<1x768xf32>
    %4 = vector.broadcast %3 : vector<1x768xf32> to vector<8x768xf32>
    %5 = arith.addf %2, %4 : vector<8x768xf32>
    %6 = math.tanh %5 : vector<8x768xf32>
    %c0_5 = arith.constant 0 : index
    %c0_6 = arith.constant 0 : index
    %7 = vector.load %arg4[%c0_5, %c0_6] : memref<8x768xf32, #tpu.memory_space<vmem>>, vector<8x768xf32>
    %8 = arith.mulf %6, %7 : vector<8x768xf32>
    %c0_7 = arith.constant 0 : index
    %c0_8 = arith.constant 0 : index
    %9 = vector.load %arg5[%c0_7, %c0_8] : memref<8x768xf32, #tpu.memory_space<vmem>>, vector<8x768xf32>
    tpu.vector_store %arg5[%c0_7, %c0_8], %8 {strides = array<i32>} : memref<8x768xf32, #tpu.memory_space<vmem>>, vector<8x768xf32>,
    return
  }
  func.func @transform_0(%arg0: i32) -> (i32, i32) {
    %c0_i32 = arith.constant 0 : i32
    %c0_i32_0 = arith.constant 0 : i32
    %c0_i32_1 = arith.constant 0 : i32
    return %c0_i32, %c0_i32_0 : i32, i32
  }
  func.func @transform_1(%arg0: i32) -> (i32, i32) {
    %c0_i32 = arith.constant 0 : i32
    %c0_i32_0 = arith.constant 0 : i32
    return %c0_i32, %arg0 : i32, i32
  }
  func.func @transform_2(%arg0: i32) -> (i32, i32) {
    %c0_i32 = arith.constant 0 : i32
    %c0_i32_0 = arith.constant 0 : i32
    return %c0_i32, %arg0 : i32, i32
  }
  func.func @transform_3(%arg0: i32) -> (i32, i32) {
    %c0_i32 = arith.constant 0 : i32
    %c0_i32_0 = arith.constant 0 : i32
    return %c0_i32, %arg0 : i32, i32
  }
  func.func @transform_4(%arg0: i32) -> (i32, i32) {
    %c0_i32 = arith.constant 0 : i32
    %c0_i32_0 = arith.constant 0 : i32
    return %c0_i32, %arg0 : i32, i32
  }
}

</mosaic_0001>

<bundles_post_ra>
// kernel: tpu_custom_call.1
= control target key start
LH: loop header
LB: loop body
LE: loop exit
PB: predicated region body
PF: predicated region fallthrough
CT: control target
= control target key end

     0   :  { %9 = vsyncpa [#allocation3], 0  ;;  %s4281_s0 = inlined_call_operand.hbm [shape: bf16[8,1024], index: 0, kind: input, shape index: {}]   ;;  %s4282_s1 = inlined_call_operand.hbm [shape: bf16[1024,768], index: 1, kind: input, shape index: {}]   ;;  %s4283_s2 = inlined_call_operand.hbm [shape: f32[1,768], index: 2, kind: input, shape index: {}]   ;;  %s4284_s3 = inlined_call_operand.hbm [shape: f32[8,768], index: 3, kind: input, shape index: {}]   ;;  %s4285_s4 = inlined_call_operand.hbm [shape: f32[8,768], index: 4, kind: output, shape index: {}]  }
   0x1   :  { %10 = vsyncpa [#allocation6], 0 }
   0x2   :  { %11 = vsyncpa [#allocation9], 0 }
   0x3   :  { %12 = vsyncpa [#allocation4], 0  ;;  %s4121_s15 = smov [#allocation5]   ;;  %s4003_s19 = scalar_lea.hbm %s4282_s1, 49152 }
   0x4   :  { %s28_s16 = sshll.u32 %s4121_s15, 4  ;;  %p4004_p0 = scmp.ne.s32.totalorder %s4282_s1, %s4003_s19  ;;  %s29_s16 = int_to_ptr.vmem [resolvable:$true] %s28_s16 }
   0x5   :  { %p4007_p1 = scmp.lt.u32.totalorder %s4003_s19, %s4282_s1 }
   0x7   :  { %p4009_p2 = pnand %p4007_p1, %p4004_p0 }
   0x9   :  { %4012 = shalt.err (!%p4009_p2)
}
   0xa   :  { %s4013_s24 = scalar_lea.vmem %s29_s16, 49152  ;;  %p4018_p4 = scmp.lt.s32.totalorder %s29_s16, %s29_s16 }
   0xb   :  { %p4014_p3 = scmp.ne.s32.totalorder %s29_s16, %s4013_s24  ;;  %p4019_p5 = scmp.lt.s32.totalorder %s4013_s24, %s4013_s24 }
   0xd   :  { %p4020_p6 = por %p4019_p5, %p4018_p4 }
   0xf   :  { %p4021_p7 = pnand %p4020_p6, %p4014_p3 }
  0x11   :  { %4024 = shalt.err (!%p4021_p7)
}
  0x12   :  { %s4122_s25 = smov 384   ;;  %s4123_s26 = smov 24  }
  0x13   :  { %34 = dma.hbm_to_vmem [thread:$0]  %s4282_s1, 49152, %s29_s16, [#allocation6], %s4122_s25, %s4122_s25, %s4123_s26  }
  0x14   :  { %s4124_s29 = smov [#allocation2]   ;;  %s4125_s5 = smov [#allocation7]  }
  0x15   :  { %s19_s30 = sshll.u32 %s4124_s29, 4  ;;  %s41_s6 = sshll.u32 %s4125_s5, 4  ;;  %s20_s30 = int_to_ptr.vmem [resolvable:$true] %s19_s30  ;;  %s42_s6 = int_to_ptr.vmem [resolvable:$true] %s41_s6 }
  0x16   :  { %s4025_s9 = scalar_lea.hbm %s4281_s0, 512 }
  0x17   :  { %p4026_p8 = scmp.ne.s32.totalorder %s4281_s0, %s4025_s9  ;;  %p4029_p9 = scmp.lt.u32.totalorder %s4025_s9, %s4281_s0 }
  0x19   :  { %p4031_p10 = pnand %p4029_p9, %p4026_p8 }
  0x1b   :  { %4034 = shalt.err (!%p4031_p10)
}
  0x1c   :  { %s4035_s1 = scalar_lea.vmem %s20_s30, 512  ;;  %p4040_p12 = scmp.lt.s32.totalorder %s20_s30, %s20_s30 }
  0x1d   :  { %p4036_p11 = scmp.ne.s32.totalorder %s20_s30, %s4035_s1  ;;  %p4041_p13 = scmp.lt.s32.totalorder %s4035_s1, %s4035_s1 }
  0x1f   :  { %p4042_p0 = por %p4041_p13, %p4040_p12 }
  0x21   :  { %p4043_p1 = pnand %p4042_p0, %p4036_p11 }
  0x23   :  { %4046 = shalt.err (!%p4043_p1)
}
  0x24   :  { %22 = dma.hbm_to_vmem [thread:$0]  %s4281_s0, 512, %s20_s30, [#allocation3]  }
  0x25   :  { %s4047_s18 = scalar_lea.hbm %s4283_s2, 96 }
  0x26   :  { %p4048_p2 = scmp.ne.s32.totalorder %s4283_s2, %s4047_s18  ;;  %p4051_p3 = scmp.lt.u32.totalorder %s4047_s18, %s4283_s2 }
  0x28   :  { %p4053_p4 = pnand %p4051_p3, %p4048_p2 }
  0x2a   :  { %4056 = shalt.err (!%p4053_p4)
}
  0x2b   :  { %s4057_s23 = scalar_lea.vmem %s42_s6, 96  ;;  %p4062_p6 = scmp.lt.s32.totalorder %s42_s6, %s42_s6 }
  0x2c   :  { %p4058_p5 = scmp.ne.s32.totalorder %s42_s6, %s4057_s23  ;;  %p4063_p7 = scmp.lt.s32.totalorder %s4057_s23, %s4057_s23 }
  0x2e   :  { %p4064_p8 = por %p4063_p7, %p4062_p6 }
  0x30   :  { %p4065_p9 = pnand %p4064_p8, %p4058_p5 }
  0x32   :  { %4068 = shalt.err (!%p4065_p9)
}
  0x33   :  { %44 = dma.hbm_to_vmem [thread:$0]  %s4283_s2, 96, %s42_s6, [#allocation6]  }
  0x34   :  { %s4126_s25 = smov [#allocation8]   ;;  %s4069_s29 = scalar_lea.hbm %s4284_s3, 768 }
  0x35   :  { %s51_s26 = sshll.u32 %s4126_s25, 4  ;;  %p4070_p10 = scmp.ne.s32.totalorder %s4284_s3, %s4069_s29  ;;  %s52_s26 = int_to_ptr.vmem [resolvable:$true] %s51_s26 }
  0x36   :  { %p4073_p11 = scmp.lt.u32.totalorder %s4069_s29, %s4284_s3 }
  0x38   :  { %p4075_p12 = pnand %p4073_p11, %p4070_p10 }
  0x3a   :  { %4078 = shalt.err (!%p4075_p12)
}
  0x3b   :  { %s4079_s9 = scalar_lea.vmem %s52_s26, 768  ;;  %p4084_p0 = scmp.lt.s32.totalorder %s52_s26, %s52_s26 }
  0x3c   :  { %p4080_p13 = scmp.ne.s32.totalorder %s52_s26, %s4079_s9  ;;  %p4085_p1 = scmp.lt.s32.totalorder %s4079_s9, %s4079_s9 }
  0x3e   :  { %p4086_p2 = por %p4085_p1, %p4084_p0 }
  0x40   :  { %p4087_p3 = pnand %p4086_p2, %p4080_p13 }
  0x42   :  { %4090 = shalt.err (!%p4087_p3)
}
  0x43   :  { %54 = dma.hbm_to_vmem [thread:$0]  %s4284_s3, 768, %s52_s26, [#allocation9]  }
  0x44   :  { %4113 = dma.done.wait [#allocation3], 512  }
  0x45   :  { %4114 = vsyncadd [#allocation3], 4294966784 }
  0x46   :  { %4115 = dma.done.wait [#allocation6], 49248  }
  0x47   :  { %4116 = vsyncadd [#allocation6], 4294918048 }
  0x48   :  { %4117 = dma.done.wait [#allocation9], 768  }
  0x49   :  { %4118 = vsyncadd [#allocation9], 4294966528  ;;  %v3407_v0 = vld [vmem:[#allocation5 + $0x4] ss:$24 sps:$4 sm:$0xff]   ;;  %v3411_v2 = vld [vmem:[#allocation5] ss:$24 sps:$4 sm:$0xff]  }
  0x4a   :  { %v3409_v1 = vld [vmem:[#allocation5 + $0x604] ss:$24 sps:$4 sm:$0xff]   ;;  %2435 = vmatprep.subr.bf16.mxu1 %v3407_v0  ;;  %v3412_v3 = vld [vmem:[#allocation5 + $0x600] ss:$24 sps:$4 sm:$0xff]   ;;  %v3413_v4 = vld [vmem:[#allocation5 + $0x34] ss:$24 sps:$4 sm:$0xff]  }
  0x4b   :  { %2517 = vmatprep.subr.bf16.mxu0 %v3409_v1  ;;  %2436 = vmatpush1.bf16.msra.mxu1 %v3411_v2  ;;  %v3415_v5 = vld [vmem:[#allocation5 + $0x634] ss:$24 sps:$4 sm:$0xff]   ;;  %v3417_v6 = vld [vmem:[#allocation5 + $0x30] ss:$24 sps:$4 sm:$0xff]   ;;  %v3419_v8 = vld [vmem:[#allocation5 + $0x64] ss:$24 sps:$4 sm:$0xff]  }
  0x4c   :  { %2518 = vmatpush1.bf16.msra.mxu0 %v3412_v3  ;;  %2437 = vmatprep.subr.bf16.mxu1 %v3413_v4  ;;  %v3418_v7 = vld [vmem:[#allocation5 + $0x630] ss:$24 sps:$4 sm:$0xff]   ;;  %v3421_v9 = vld [vmem:[#allocation5 + $0x664] ss:$24 sps:$4 sm:$0xff]   ;;  %v3423_v10 = vld [vmem:[#allocation5 + $0x60] ss:$24 sps:$4 sm:$0xff]  }
  0x4d   :  { %2519 = vmatprep.subr.bf16.mxu0 %v3415_v5  ;;  %v3424_v11 = vld [vmem:[#allocation5 + $0x660] ss:$24 sps:$4 sm:$0xff]   ;;  %v3425_v12 = vld [vmem:[#allocation5 + $0x94] ss:$24 sps:$4 sm:$0xff]   ;;  %v3429_v14 = vld [vmem:[#allocation5 + $0x90] ss:$24 sps:$4 sm:$0xff]  }
  0x4e   :  { %v3427_v13 = vld [vmem:[#allocation5 + $0x694] ss:$24 sps:$4 sm:$0xff]   ;;  %v3430_v15 = vld [vmem:[#allocation5 + $0x690] ss:$24 sps:$4 sm:$0xff]   ;;  %v3431_v16 = vld [vmem:[#allocation5 + $0xc4] ss:$24 sps:$4 sm:$0xff]  }
  0x4f   :  { %2438 = vmatpush1.bf16.msra.mxu1 %v3417_v6  ;;  %v3433_v17 = vld [vmem:[#allocation5 + $0x6c4] ss:$24 sps:$4 sm:$0xff]   ;;  %v3435_v18 = vld [vmem:[#allocation5 + $0xc0] ss:$24 sps:$4 sm:$0xff]   ;;  %v3437_v20 = vld [vmem:[#allocation5 + $0xf4] ss:$24 sps:$4 sm:$0xff]  }
  0x50   :  { %2520 = vmatpush1.bf16.msra.mxu0 %v3418_v7  ;;  %2439 = vmatprep.subr.bf16.mxu1 %v3419_v8  ;;  %v3436_v19 = vld [vmem:[#allocation5 + $0x6c0] ss:$24 sps:$4 sm:$0xff]   ;;  %v3439_v21 = vld [vmem:[#allocation5 + $0x6f4] ss:$24 sps:$4 sm:$0xff]   ;;  %v3441_v22 = vld [vmem:[#allocation5 + $0xf0] ss:$24 sps:$4 sm:$0xff]  }
  0x51   :  { %2521 = vmatprep.subr.bf16.mxu0 %v3421_v9  ;;  %v3442_v23 = vld [vmem:[#allocation5 + $0x6f0] ss:$24 sps:$4 sm:$0xff]   ;;  %v3443_v24 = vld [vmem:[#allocation5 + $0x124] ss:$24 sps:$4 sm:$0xff]   ;;  %v3447_v26 = vld [vmem:[#allocation5 + $0x120] ss:$24 sps:$4 sm:$0xff]  }
  0x52   :  { %v3445_v25 = vld [vmem:[#allocation5 + $0x724] ss:$24 sps:$4 sm:$0xff]   ;;  %v3448_v27 = vld [vmem:[#allocation5 + $0x720] ss:$24 sps:$4 sm:$0xff]   ;;  %v3449_v28 = vld [vmem:[#allocation5 + $0x154] ss:$24 sps:$4 sm:$0xff]  }
  0x53   :  { %2440 = vmatpush1.bf16.msra.mxu1 %v3423_v10  ;;  %v3451_v29 = vld [vmem:[#allocation5 + $0x754] ss:$24 sps:$4 sm:$0xff]   ;;  %v3453_v30 = vld [vmem:[#allocation5 + $0x150] ss:$24 sps:$4 sm:$0xff]   ;;  %v3455_v32 = vld [vmem:[#allocation5 + $0x184] ss:$24 sps:$4 sm:$0xff]  }
  0x54   :  { %2522 = vmatpush1.bf16.msra.mxu0 %v3424_v11  ;;  %2441 = vmatprep.subr.bf16.mxu1 %v3425_v12  ;;  %v3454_v31 = vld [vmem:[#allocation5 + $0x750] ss:$24 sps:$4 sm:$0xff]   ;;  %v3457_v33 = vld [vmem:[#allocation5 + $0x784] ss:$24 sps:$4 sm:$0xff]   ;;  %v3459_v34 = vld [vmem:[#allocation5 + $0x180] ss:$24 sps:$4 sm:$0xff]  }
  0x55   :  { %2523 = vmatprep.subr.bf16.mxu0 %v3427_v13  ;;  %v3460_v35 = vld [vmem:[#allocation5 + $0x780] ss:$24 sps:$4 sm:$0xff]   ;;  %v3461_v36 = vld [vmem:[#allocation5 + $0x1b4] ss:$24 sps:$4 sm:$0xff]   ;;  %v3465_v38 = vld [vmem:[#allocation5 + $0x1b0] ss:$24 sps:$4 sm:$0xff]  }
  0x56   :  { %v3463_v37 = vld [vmem:[#allocation5 + $0x7b4] ss:$24 sps:$4 sm:$0xff]   ;;  %v3466_v39 = vld [vmem:[#allocation5 + $0x7b0] ss:$24 sps:$4 sm:$0xff]   ;;  %v3467_v40 = vld [vmem:[#allocation5 + $0x1e4] ss:$24 sps:$4 sm:$0xff]  }
  0x57   :  { %2442 = vmatpush1.bf16.msra.mxu1 %v3429_v14  ;;  %v3469_v41 = vld [vmem:[#allocation5 + $0x7e4] ss:$24 sps:$4 sm:$0xff]   ;;  %v3471_v42 = vld [vmem:[#allocation5 + $0x1e0] ss:$24 sps:$4 sm:$0xff]   ;;  %v3473_v44 = vld [vmem:[#allocation5 + $0x214] ss:$24 sps:$4 sm:$0xff]  }
  0x58   :  { %2524 = vmatpush1.bf16.msra.mxu0 %v3430_v15  ;;  %2443 = vmatprep.subr.bf16.mxu1 %v3431_v16  ;;  %v3472_v43 = vld [vmem:[#allocation5 + $0x7e0] ss:$24 sps:$4 sm:$0xff]   ;;  %v3475_v45 = vld [vmem:[#allocation5 + $0x814] ss:$24 sps:$4 sm:$0xff]   ;;  %v3477_v47 = vld [vmem:[#allocation5 + $0x210] ss:$24 sps:$4 sm:$0xff]  }
  0x59   :  { %2525 = vmatprep.subr.bf16.mxu0 %v3433_v17  ;;  %v67_v46 = vld [vmem:[#allocation2] sm:$0xff]  ;;  %v3478_v49 = vld [vmem:[#allocation5 + $0x810] ss:$24 sps:$4 sm:$0xff]   ;;  %v3485_v56 = vld [vmem:[#allocation5 + $0x274] ss:$24 sps:$4 sm:$0xff]   ;;  %s4127_s3 = smov [#allocation10]  }
  0x5a   :  { %v4201_v48 = vcombine.high %v67_v46, %v67_v46  ;;  %v69_v50 = vld [vmem:[#allocation2 + $0x10] sm:$0xff]  ;;  %v3479_v51 = vld [vmem:[#allocation5 + $0x244] ss:$24 sps:$4 sm:$0xff]   ;;  %v3483_v54 = vld [vmem:[#allocation5 + $0x240] ss:$24 sps:$4 sm:$0xff]   ;;  %v4207_v6 = vcombine.low %v67_v46, %v67_v46  ;;  %s2957_s10 = sshll.u32 %s4127_s3, 4  ;;  %s2958_s10 = int_to_ptr.vmem [resolvable:$true] %s2957_s10 }
  0x5b   :  { %2444 = vmatpush1.bf16.msra.mxu1 %v3435_v18  ;;  %v3481_v52 = vld [vmem:[#allocation5 + $0x844] ss:$24 sps:$4 sm:$0xff]   ;;  %v4203_v53 = vcombine.high %v69_v50, %v69_v50  ;;  %v3484_v55 = vld [vmem:[#allocation5 + $0x840] ss:$24 sps:$4 sm:$0xff]   ;;  %v3487_v57 = vld [vmem:[#allocation5 + $0x874] ss:$24 sps:$4 sm:$0xff]   ;;  %v4209_v7 = vcombine.low %v69_v50, %v69_v50  ;;  %p4096_p5 = scmp.lt.s32.totalorder %s2958_s10, %s2958_s10 }
  0x5c   :  { %2526 = vmatpush1.bf16.msra.mxu0 %v3436_v19  ;;  %2445 = vmatprep.subr.bf16.mxu1 %v3437_v20  ;;  %v3489_v58 = vld [vmem:[#allocation5 + $0x270] ss:$24 sps:$4 sm:$0xff]   ;;  %v3491_v60 = vld [vmem:[#allocation5 + $0x2a4] ss:$24 sps:$4 sm:$0xff]   ;;  %v3495_v62 = vld [vmem:[#allocation5 + $0x2a0] ss:$24 sps:$4 sm:$0xff]  }
  0x5d   :  { %2527 = vmatprep.subr.bf16.mxu0 %v3439_v21  ;;  %2467 = vmatprep.mubr.bf16.mxu1 %v4201_v48  ;;  %v3490_v59 = vld [vmem:[#allocation5 + $0x870] ss:$24 sps:$4 sm:$0xff]   ;;  %v3493_v61 = vld [vmem:[#allocation5 + $0x8a4] ss:$24 sps:$4 sm:$0xff]   ;;  %v3496_v63 = vld [vmem:[#allocation5 + $0x8a0] ss:$24 sps:$4 sm:$0xff]  }
  0x5e   :  { %2549 = vmatprep.mubr.bf16.mxu0 %v4203_v53  ;;  %v3497_v0 = vld [vmem:[#allocation5 + $0x2d4] ss:$24 sps:$4 sm:$0xff]   ;;  %v3501_v2 = vld [vmem:[#allocation5 + $0x2d0] ss:$24 sps:$4 sm:$0xff]   ;;  %v3506_v4 = vld [vmem:[#allocation5 + $0x304] ss:$24 sps:$4 sm:$0xff]  }
  0x5f   :  { %2446 = vmatpush1.bf16.msra.mxu1 %v3441_v22  ;;  %v3499_v1 = vld [vmem:[#allocation5 + $0x8d4] ss:$24 sps:$4 sm:$0xff]   ;;  %v3502_v3 = vld [vmem:[#allocation5 + $0x8d0] ss:$24 sps:$4 sm:$0xff]   ;;  %v3510_v5 = vld [vmem:[#allocation5 + $0x904] ss:$24 sps:$4 sm:$0xff]  }
  0x60   :  { %2528 = vmatpush1.bf16.msra.mxu0 %v3442_v23  ;;  %2447 = vmatprep.subr.bf16.mxu1 %v3443_v24  ;;  %v3504_v8 = vld [vmem:[#allocation5 + $0x300] ss:$24 sps:$4 sm:$0xff]   ;;  %v3515_v10 = vld [vmem:[#allocation5 + $0x334] ss:$24 sps:$4 sm:$0xff]   ;;  %v3513_v12 = vld [vmem:[#allocation5 + $0x330] ss:$24 sps:$4 sm:$0xff]  }
  0x61   :  { %2529 = vmatprep.subr.bf16.mxu0 %v3445_v25  ;;  %v3508_v9 = vld [vmem:[#allocation5 + $0x900] ss:$24 sps:$4 sm:$0xff]   ;;  %v3518_v11 = vld [vmem:[#allocation5 + $0x934] ss:$24 sps:$4 sm:$0xff]   ;;  %v3516_v13 = vld [vmem:[#allocation5 + $0x930] ss:$24 sps:$4 sm:$0xff]  }
  0x62   :  { %v3521_v14 = vld [vmem:[#allocation5 + $0x364] ss:$24 sps:$4 sm:$0xff]   ;;  %v3519_v16 = vld [vmem:[#allocation5 + $0x360] ss:$24 sps:$4 sm:$0xff]   ;;  %v3527_v18 = vld [vmem:[#allocation5 + $0x394] ss:$24 sps:$4 sm:$0xff]  }
  0x63   :  { %2448 = vmatpush1.bf16.msra.mxu1 %v3447_v26  ;;  %v3524_v15 = vld [vmem:[#allocation5 + $0x964] ss:$24 sps:$4 sm:$0xff]   ;;  %v3522_v17 = vld [vmem:[#allocation5 + $0x960] ss:$24 sps:$4 sm:$0xff]   ;;  %v3530_v19 = vld [vmem:[#allocation5 + $0x994] ss:$24 sps:$4 sm:$0xff]  }
  0x64   :  { %2530 = vmatpush1.bf16.msra.mxu0 %v3448_v27  ;;  %2449 = vmatprep.subr.bf16.mxu1 %v3449_v28  ;;  %v3525_v20 = vld [vmem:[#allocation5 + $0x390] ss:$24 sps:$4 sm:$0xff]   ;;  %v3533_v22 = vld [vmem:[#allocation5 + $0x3c4] ss:$24 sps:$4 sm:$0xff]   ;;  %v3531_v24 = vld [vmem:[#allocation5 + $0x3c0] ss:$24 sps:$4 sm:$0xff]  }
  0x65   :  { %2531 = vmatprep.subr.bf16.mxu0 %v3451_v29  ;;  %v3528_v21 = vld [vmem:[#allocation5 + $0x990] ss:$24 sps:$4 sm:$0xff]   ;;  %v3536_v23 = vld [vmem:[#allocation5 + $0x9c4] ss:$24 sps:$4 sm:$0xff]   ;;  %v3534_v25 = vld [vmem:[#allocation5 + $0x9c0] ss:$24 sps:$4 sm:$0xff]  }
  0x66   :  { %v3539_v26 = vld [vmem:[#allocation5 + $0x3f4] ss:$24 sps:$4 sm:$0xff]   ;;  %v3537_v28 = vld [vmem:[#allocation5 + $0x3f0] ss:$24 sps:$4 sm:$0xff]   ;;  %s4091_s11 = scalar_lea.vmem %s2958_s10, 768 }
  0x67   :  { %2450 = vmatpush1.bf16.msra.mxu1 %v3453_v30  ;;  %v3542_v27 = vld [vmem:[#allocation5 + $0x9f4] ss:$24 sps:$4 sm:$0xff]   ;;  %v3540_v29 = vld [vmem:[#allocation5 + $0x9f0] ss:$24 sps:$4 sm:$0xff]   ;;  %v3545_v30 = vld [vmem:[#allocation5 + $0x424] ss:$24 sps:$4 sm:$0xff]   ;;  %p4092_p4 = scmp.ne.s32.totalorder %s2958_s10, %s4091_s11  ;;  %p4097_p6 = scmp.lt.s32.totalorder %s4091_s11, %s4091_s11 }
  0x68   :  { %2532 = vmatpush1.bf16.msra.mxu0 %v3454_v31  ;;  %2451 = vmatprep.subr.bf16.mxu1 %v3455_v32  ;;  %v3548_v31 = vld [vmem:[#allocation5 + $0xa24] ss:$24 sps:$4 sm:$0xff]   ;;  %v4213_v32 = vld [vmem:[#allocation2 + $0x8] sm:$0xff] }
  0x69   :  { %2533 = vmatprep.subr.bf16.mxu0 %v3457_v33  ;;  %v4215_v33 = vld [vmem:[#allocation2 + $0x18] sm:$0xff]  ;;  %v3563_v46 = vld [vmem:[#allocation5 + $0x4b4] ss:$24 sps:$4 sm:$0xff]   ;;  %v3564_v50 = vld [vmem:[#allocation5 + $0xab0] ss:$24 sps:$4 sm:$0xff]   ;;  %p4098_p7 = por %p4097_p6, %p4096_p5 }
  0x6b   :  { %2452 = vmatpush1.bf16.msra.mxu1 %v3459_v34  ;;  %v3543_v34 = vld [vmem:[#allocation5 + $0x420] ss:$24 sps:$4 sm:$0xff]   ;;  %p4099_p8 = pnand %p4098_p7, %p4092_p4 }
  0x6c   :  { %2534 = vmatpush1.bf16.msra.mxu0 %v3460_v35  ;;  %2453 = vmatprep.subr.bf16.mxu1 %v3461_v36  ;;  %v3546_v35 = vld [vmem:[#allocation5 + $0xa20] ss:$24 sps:$4 sm:$0xff]   ;;  %v4219_v36 = vcombine.high %v4213_v32, %v4213_v32 }
  0x6d   :  { %2535 = vmatprep.subr.bf16.mxu0 %v3463_v37  ;;  %v4223_v37 = vcombine.high %v4215_v33, %v4215_v33 }
  0x6f   :  { %2454 = vmatpush1.bf16.msra.mxu1 %v3465_v38  ;;  %v3551_v38 = vld [vmem:[#allocation5 + $0x454] ss:$24 sps:$4 sm:$0xff]  }
  0x70   :  { %2536 = vmatpush1.bf16.msra.mxu0 %v3466_v39  ;;  %2455 = vmatprep.subr.bf16.mxu1 %v3467_v40  ;;  %v3554_v39 = vld [vmem:[#allocation5 + $0xa54] ss:$24 sps:$4 sm:$0xff]   ;;  %v3549_v40 = vld [vmem:[#allocation5 + $0x450] ss:$24 sps:$4 sm:$0xff]  }
  0x71   :  { %2537 = vmatprep.subr.bf16.mxu0 %v3469_v41  ;;  %v3552_v41 = vld [vmem:[#allocation5 + $0xa50] ss:$24 sps:$4 sm:$0xff]  }
  0x73   :  { %2456 = vmatpush1.bf16.msra.mxu1 %v3471_v42  ;;  %v3557_v42 = vld [vmem:[#allocation5 + $0x484] ss:$24 sps:$4 sm:$0xff]  }
  0x74   :  { %2538 = vmatpush1.bf16.msra.mxu0 %v3472_v43  ;;  %2457 = vmatprep.subr.bf16.mxu1 %v3473_v44  ;;  %v3560_v43 = vld [vmem:[#allocation5 + $0xa84] ss:$24 sps:$4 sm:$0xff]   ;;  %v3555_v44 = vld [vmem:[#allocation5 + $0x480] ss:$24 sps:$4 sm:$0xff]  }
  0x75   :  { %2539 = vmatprep.subr.bf16.mxu0 %v3475_v45  ;;  %v3558_v45 = vld [vmem:[#allocation5 + $0xa80] ss:$24 sps:$4 sm:$0xff]  }
  0x77   :  { %2458 = vmatpush1.bf16.msra.mxu1 %v3477_v47  ;;  %v3566_v47 = vld [vmem:[#allocation5 + $0xab4] ss:$24 sps:$4 sm:$0xff]  }
  0x78   :  { %2540 = vmatpush1.bf16.msra.mxu0 %v3478_v49  ;;  %2459 = vmatprep.subr.bf16.mxu1 %v3479_v51  ;;  %v3561_v49 = vld [vmem:[#allocation5 + $0x4b0] ss:$24 sps:$4 sm:$0xff]   ;;  %v3569_v51 = vld [vmem:[#allocation5 + $0x4e4] ss:$24 sps:$4 sm:$0xff]  }
  0x79   :  { %2541 = vmatprep.subr.bf16.mxu0 %v3481_v52  ;;  %v3572_v52 = vld [vmem:[#allocation5 + $0xae4] ss:$24 sps:$4 sm:$0xff]  }
  0x7b   :  { %2460 = vmatpush1.bf16.msra.mxu1 %v3483_v54  ;;  %v3567_v54 = vld [vmem:[#allocation5 + $0x4e0] ss:$24 sps:$4 sm:$0xff]  }
  0x7c   :  { %2542 = vmatpush1.bf16.msra.mxu0 %v3484_v55  ;;  %2461 = vmatprep.subr.bf16.mxu1 %v3485_v56  ;;  %v3570_v55 = vld [vmem:[#allocation5 + $0xae0] ss:$24 sps:$4 sm:$0xff]   ;;  %v3575_v56 = vld [vmem:[#allocation5 + $0x514] ss:$24 sps:$4 sm:$0xff]  }
  0x7d   :  { %2543 = vmatprep.subr.bf16.mxu0 %v3487_v57  ;;  %v3578_v57 = vld [vmem:[#allocation5 + $0xb14] ss:$24 sps:$4 sm:$0xff]  }
  0x7f   :  { %2462 = vmatpush1.bf16.msra.mxu1 %v3489_v58  ;;  %v3573_v58 = vld [vmem:[#allocation5 + $0x510] ss:$24 sps:$4 sm:$0xff]  }
  0x80   :  { %2544 = vmatpush1.bf16.msra.mxu0 %v3490_v59  ;;  %2463 = vmatprep.subr.bf16.mxu1 %v3491_v60  ;;  %v3576_v59 = vld [vmem:[#allocation5 + $0xb10] ss:$24 sps:$4 sm:$0xff]   ;;  %v3581_v60 = vld [vmem:[#allocation5 + $0x544] ss:$24 sps:$4 sm:$0xff]  }
  0x81   :  { %2545 = vmatprep.subr.bf16.mxu0 %v3493_v61  ;;  %v3584_v61 = vld [vmem:[#allocation5 + $0xb44] ss:$24 sps:$4 sm:$0xff]  }
  0x83   :  { %2464 = vmatpush1.bf16.msra.mxu1 %v3495_v62  ;;  %v3579_v62 = vld [vmem:[#allocation5 + $0x540] ss:$24 sps:$4 sm:$0xff]  }
  0x84   :  { %2546 = vmatpush1.bf16.msra.mxu0 %v3496_v63  ;;  %2465 = vmatprep.subr.bf16.mxu1 %v3497_v0  ;;  %v3582_v63 = vld [vmem:[#allocation5 + $0xb40] ss:$24 sps:$4 sm:$0xff]   ;;  %v3587_v0 = vld [vmem:[#allocation5 + $0x574] ss:$24 sps:$4 sm:$0xff]  }
  0x85   :  { %2547 = vmatprep.subr.bf16.mxu0 %v3499_v1  ;;  %v3590_v1 = vld [vmem:[#allocation5 + $0xb74] ss:$24 sps:$4 sm:$0xff]  }
  0x87   :  { %2466 = vmatpush1.bf16.msra.mxu1 %v3501_v2  ;;  %v3585_v2 = vld [vmem:[#allocation5 + $0x570] ss:$24 sps:$4 sm:$0xff]  }
  0x88   :  { %2548 = vmatpush1.bf16.msra.mxu0 %v3502_v3  ;;  %2476 = vmatprep.subr.bf16.mxu1 %v3506_v4  ;;  %v3588_v3 = vld [vmem:[#allocation5 + $0xb70] ss:$24 sps:$4 sm:$0xff]   ;;  %v3593_v4 = vld [vmem:[#allocation5 + $0x5a4] ss:$24 sps:$4 sm:$0xff]  }
  0x89   :  { %2558 = vmatprep.subr.bf16.mxu0 %v3510_v5  ;;  %v3596_v5 = vld [vmem:[#allocation5 + $0xba4] ss:$24 sps:$4 sm:$0xff]  }
  0x8a   :  { %2468 = vmatmul.mubr.bf16.vlgmr.msra.gmra.mrb[0].mxu1 %v4207_v6 }
  0x8b   :  { %2550 = vmatmul.mubr.bf16.vlgmr.msra.gmra.mrb[0].mxu0 %v4209_v7  ;;  %2477 = vmatpush1.bf16.msra.mxu1 %v3504_v8  ;;  %v3591_v8 = vld [vmem:[#allocation5 + $0x5a0] ss:$24 sps:$4 sm:$0xff]  }
  0x8c   :  { %2559 = vmatpush1.bf16.msra.mxu0 %v3508_v9  ;;  %2478 = vmatprep.subr.bf16.mxu1 %v3515_v10  ;;  %v3594_v9 = vld [vmem:[#allocation5 + $0xba0] ss:$24 sps:$4 sm:$0xff]   ;;  %v3599_v10 = vld [vmem:[#allocation5 + $0x5d4] ss:$24 sps:$4 sm:$0xff]  }
  0x8d   :  { %2560 = vmatprep.subr.bf16.mxu0 %v3518_v11  ;;  %2508 = vmatprep.mubr.bf16.mxu1 %v4219_v36  ;;  %v3602_v11 = vld [vmem:[#allocation5 + $0xbd4] ss:$24 sps:$4 sm:$0xff]  }
  0x8e   :  { %2590 = vmatprep.mubr.bf16.mxu0 %v4223_v37 }
  0x8f   :  { %2479 = vmatpush1.bf16.msra.mxu1 %v3513_v12  ;;  %v3597_v12 = vld [vmem:[#allocation5 + $0x5d0] ss:$24 sps:$4 sm:$0xff]  }
  0x90   :  { %2561 = vmatpush1.bf16.msra.mxu0 %v3516_v13  ;;  %2480 = vmatprep.subr.bf16.mxu1 %v3521_v14  ;;  %v3600_v13 = vld [vmem:[#allocation5 + $0xbd0] ss:$24 sps:$4 sm:$0xff]   ;;  %v3609_v14 = vld [vmem:[#allocation5 + $0xc] ss:$24 sps:$4 sm:$0xff]  }
  0x91   :  { %2562 = vmatprep.subr.bf16.mxu0 %v3524_v15  ;;  %v3612_v15 = vld [vmem:[#allocation5 + $0x14] ss:$24 sps:$4 sm:$0xff]  }
  0x93   :  { %2481 = vmatpush1.bf16.msra.mxu1 %v3519_v16  ;;  %v4229_v16 = vcombine.low %v4213_v32, %v4213_v32  ;;  %v3633_v32 = vld [vmem:[#allocation5 + $0xcc] ss:$24 sps:$4 sm:$0xff]  }
  0x94   :  { %2563 = vmatpush1.bf16.msra.mxu0 %v3522_v17  ;;  %2482 = vmatprep.subr.bf16.mxu1 %v3527_v18  ;;  %v4233_v17 = vcombine.low %v4215_v33, %v4215_v33  ;;  %v3607_v18 = vld [vmem:[#allocation5 + $0x8] ss:$24 sps:$4 sm:$0xff]   ;;  %v3636_v33 = vld [vmem:[#allocation5 + $0xd4] ss:$24 sps:$4 sm:$0xff]  }
  0x95   :  { %2564 = vmatprep.subr.bf16.mxu0 %v3530_v19  ;;  %v3610_v19 = vld [vmem:[#allocation5 + $0x10] ss:$24 sps:$4 sm:$0xff]  }
  0x97   :  { %2483 = vmatpush1.bf16.msra.mxu1 %v3525_v20  ;;  %v3615_v20 = vld [vmem:[#allocation5 + $0x3c] ss:$24 sps:$4 sm:$0xff]  }
  0x98   :  { %2565 = vmatpush1.bf16.msra.mxu0 %v3528_v21  ;;  %2484 = vmatprep.subr.bf16.mxu1 %v3533_v22  ;;  %v3618_v21 = vld [vmem:[#allocation5 + $0x44] ss:$24 sps:$4 sm:$0xff]   ;;  %v3613_v22 = vld [vmem:[#allocation5 + $0x38] ss:$24 sps:$4 sm:$0xff]  }
  0x99   :  { %2566 = vmatprep.subr.bf16.mxu0 %v3536_v23  ;;  %v3616_v23 = vld [vmem:[#allocation5 + $0x40] ss:$24 sps:$4 sm:$0xff]  }
  0x9b   :  { %2485 = vmatpush1.bf16.msra.mxu1 %v3531_v24  ;;  %v3621_v24 = vld [vmem:[#allocation5 + $0x6c] ss:$24 sps:$4 sm:$0xff]  }
  0x9c   :  { %2567 = vmatpush1.bf16.msra.mxu0 %v3534_v25  ;;  %2486 = vmatprep.subr.bf16.mxu1 %v3539_v26  ;;  %v3624_v25 = vld [vmem:[#allocation5 + $0x74] ss:$24 sps:$4 sm:$0xff]   ;;  %v3619_v26 = vld [vmem:[#allocation5 + $0x68] ss:$24 sps:$4 sm:$0xff]  }
  0x9d   :  { %2568 = vmatprep.subr.bf16.mxu0 %v3542_v27  ;;  %v3622_v27 = vld [vmem:[#allocation5 + $0x70] ss:$24 sps:$4 sm:$0xff]  }
  0x9f   :  { %2487 = vmatpush1.bf16.msra.mxu1 %v3537_v28  ;;  %v3627_v28 = vld [vmem:[#allocation5 + $0x9c] ss:$24 sps:$4 sm:$0xff]  }
  0xa0   :  { %2569 = vmatpush1.bf16.msra.mxu0 %v3540_v29  ;;  %2488 = vmatprep.subr.bf16.mxu1 %v3545_v30  ;;  %v3630_v29 = vld [vmem:[#allocation5 + $0xa4] ss:$24 sps:$4 sm:$0xff]   ;;  %v3625_v30 = vld [vmem:[#allocation5 + $0x98] ss:$24 sps:$4 sm:$0xff]  }
  0xa1   :  { %2570 = vmatprep.subr.bf16.mxu0 %v3548_v31  ;;  %v3628_v31 = vld [vmem:[#allocation5 + $0xa0] ss:$24 sps:$4 sm:$0xff]  }
  0xa3   :  { %2489 = vmatpush1.bf16.msra.mxu1 %v3543_v34  ;;  %v3631_v34 = vld [vmem:[#allocation5 + $0xc8] ss:$24 sps:$4 sm:$0xff]  }
  0xa4   :  { %2571 = vmatpush1.bf16.msra.mxu0 %v3546_v35  ;;  %2490 = vmatprep.subr.bf16.mxu1 %v3551_v38  ;;  %v3634_v35 = vld [vmem:[#allocation5 + $0xd0] ss:$24 sps:$4 sm:$0xff]   ;;  %v3642_v38 = vld [vmem:[#allocation5 + $0x104] ss:$24 sps:$4 sm:$0xff]  }
  0xa5   :  { %2572 = vmatprep.subr.bf16.mxu0 %v3554_v39  ;;  %v3637_v39 = vld [vmem:[#allocation5 + $0xf8] ss:$24 sps:$4 sm:$0xff]  }
  0xa7   :  { %2491 = vmatpush1.bf16.msra.mxu1 %v3549_v40  ;;  %v3640_v40 = vld [vmem:[#allocation5 + $0x100] ss:$24 sps:$4 sm:$0xff]  }
  0xa8   :  { %2573 = vmatpush1.bf16.msra.mxu0 %v3552_v41  ;;  %2492 = vmatprep.subr.bf16.mxu1 %v3557_v42  ;;  %v3645_v41 = vld [vmem:[#allocation5 + $0x12c] ss:$24 sps:$4 sm:$0xff]  }
  0xa9   :  { %2574 = vmatprep.subr.bf16.mxu0 %v3560_v43  ;;  %v3648_v42 = vld [vmem:[#allocation5 + $0x134] ss:$24 sps:$4 sm:$0xff]   ;;  %v3643_v43 = vld [vmem:[#allocation5 + $0x128] ss:$24 sps:$4 sm:$0xff]  }
  0xab   :  { %2493 = vmatpush1.bf16.msra.mxu1 %v3555_v44  ;;  %v3646_v44 = vld [vmem:[#allocation5 + $0x130] ss:$24 sps:$4 sm:$0xff]  }
  0xac   :  { %2575 = vmatpush1.bf16.msra.mxu0 %v3558_v45  ;;  %2494 = vmatprep.subr.bf16.mxu1 %v3563_v46  ;;  %v3651_v45 = vld [vmem:[#allocation5 + $0x15c] ss:$24 sps:$4 sm:$0xff]  }
  0xad   :  { %2576 = vmatprep.subr.bf16.mxu0 %v3566_v47  ;;  %v3654_v46 = vld [vmem:[#allocation5 + $0x164] ss:$24 sps:$4 sm:$0xff]   ;;  %v3649_v47 = vld [vmem:[#allocation5 + $0x158] ss:$24 sps:$4 sm:$0xff]  }
  0xaf   :  { %2495 = vmatpush1.bf16.msra.mxu1 %v3561_v49  ;;  %v3652_v49 = vld [vmem:[#allocation5 + $0x160] ss:$24 sps:$4 sm:$0xff]  }
  0xb0   :  { %2577 = vmatpush1.bf16.msra.mxu0 %v3564_v50  ;;  %2496 = vmatprep.subr.bf16.mxu1 %v3569_v51  ;;  %v3657_v50 = vld [vmem:[#allocation5 + $0x18c] ss:$24 sps:$4 sm:$0xff]  }
  0xb1   :  { %2578 = vmatprep.subr.bf16.mxu0 %v3572_v52  ;;  %v3660_v51 = vld [vmem:[#allocation5 + $0x194] ss:$24 sps:$4 sm:$0xff]   ;;  %v3655_v52 = vld [vmem:[#allocation5 + $0x188] ss:$24 sps:$4 sm:$0xff]  }
  0xb3   :  { %2497 = vmatpush1.bf16.msra.mxu1 %v3567_v54  ;;  %v3658_v54 = vld [vmem:[#allocation5 + $0x190] ss:$24 sps:$4 sm:$0xff]  }
  0xb4   :  { %2579 = vmatpush1.bf16.msra.mxu0 %v3570_v55  ;;  %2498 = vmatprep.subr.bf16.mxu1 %v3575_v56  ;;  %v3663_v55 = vld [vmem:[#allocation5 + $0x1bc] ss:$24 sps:$4 sm:$0xff]  }
  0xb5   :  { %2580 = vmatprep.subr.bf16.mxu0 %v3578_v57  ;;  %v3666_v56 = vld [vmem:[#allocation5 + $0x1c4] ss:$24 sps:$4 sm:$0xff]   ;;  %v3661_v57 = vld [vmem:[#allocation5 + $0x1b8] ss:$24 sps:$4 sm:$0xff]  }
  0xb7   :  { %2499 = vmatpush1.bf16.msra.mxu1 %v3573_v58  ;;  %v3664_v58 = vld [vmem:[#allocation5 + $0x1c0] ss:$24 sps:$4 sm:$0xff]  }
  0xb8   :  { %2581 = vmatpush1.bf16.msra.mxu0 %v3576_v59  ;;  %2500 = vmatprep.subr.bf16.mxu1 %v3581_v60  ;;  %v3669_v59 = vld [vmem:[#allocation5 + $0x1ec] ss:$24 sps:$4 sm:$0xff]  }
  0xb9   :  { %2582 = vmatprep.subr.bf16.mxu0 %v3584_v61  ;;  %v3672_v60 = vld [vmem:[#allocation5 + $0x1f4] ss:$24 sps:$4 sm:$0xff]   ;;  %v3667_v61 = vld [vmem:[#allocation5 + $0x1e8] ss:$24 sps:$4 sm:$0xff]  }
  0xbb   :  { %2501 = vmatpush1.bf16.msra.mxu1 %v3579_v62  ;;  %v3670_v62 = vld [vmem:[#allocation5 + $0x1f0] ss:$24 sps:$4 sm:$0xff]  }
  0xbc   :  { %2583 = vmatpush1.bf16.msra.mxu0 %v3582_v63  ;;  %2502 = vmatprep.subr.bf16.mxu1 %v3587_v0  ;;  %v3675_v63 = vld [vmem:[#allocation5 + $0x21c] ss:$24 sps:$4 sm:$0xff]  }
  0xbd   :  { %2584 = vmatprep.subr.bf16.mxu0 %v3590_v1  ;;  %v3678_v0 = vld [vmem:[#allocation5 + $0x224] ss:$24 sps:$4 sm:$0xff]   ;;  %v3673_v1 = vld [vmem:[#allocation5 + $0x218] ss:$24 sps:$4 sm:$0xff]  }
  0xbf   :  { %2503 = vmatpush1.bf16.msra.mxu1 %v3585_v2  ;;  %v3676_v2 = vld [vmem:[#allocation5 + $0x220] ss:$24 sps:$4 sm:$0xff]  }
  0xc0   :  { %2585 = vmatpush1.bf16.msra.mxu0 %v3588_v3  ;;  %2504 = vmatprep.subr.bf16.mxu1 %v3593_v4  ;;  %v3681_v3 = vld [vmem:[#allocation5 + $0x24c] ss:$24 sps:$4 sm:$0xff]  }
  0xc1   :  { %2586 = vmatprep.subr.bf16.mxu0 %v3596_v5  ;;  %v3684_v4 = vld [vmem:[#allocation5 + $0x254] ss:$24 sps:$4 sm:$0xff]   ;;  %v3679_v5 = vld [vmem:[#allocation5 + $0x248] ss:$24 sps:$4 sm:$0xff]  }
  0xc3   :  { %2505 = vmatpush1.bf16.msra.mxu1 %v3591_v8  ;;  %v3682_v8 = vld [vmem:[#allocation5 + $0x250] ss:$24 sps:$4 sm:$0xff]  }
  0xc4   :  { %2587 = vmatpush1.bf16.msra.mxu0 %v3594_v9  ;;  %2506 = vmatprep.subr.bf16.mxu1 %v3599_v10  ;;  %v3687_v9 = vld [vmem:[#allocation5 + $0x27c] ss:$24 sps:$4 sm:$0xff]  }
  0xc5   :  { %2588 = vmatprep.subr.bf16.mxu0 %v3602_v11  ;;  %v3690_v10 = vld [vmem:[#allocation5 + $0x284] ss:$24 sps:$4 sm:$0xff]   ;;  %v3685_v11 = vld [vmem:[#allocation5 + $0x278] ss:$24 sps:$4 sm:$0xff]  }
  0xc7   :  { %2507 = vmatpush1.bf16.msra.mxu1 %v3597_v12  ;;  %v3688_v12 = vld [vmem:[#allocation5 + $0x280] ss:$24 sps:$4 sm:$0xff]  }
  0xc8   :  { %2589 = vmatpush1.bf16.msra.mxu0 %v3600_v13  ;;  %2599 = vmatprep.subr.bf16.mxu1 %v3609_v14  ;;  %v3693_v13 = vld [vmem:[#allocation5 + $0x2ac] ss:$24 sps:$4 sm:$0xff]  }
  0xc9   :  { %2763 = vmatprep.subr.bf16.mxu0 %v3612_v15  ;;  %v3696_v14 = vld [vmem:[#allocation5 + $0x2b4] ss:$24 sps:$4 sm:$0xff]   ;;  %v3691_v15 = vld [vmem:[#allocation5 + $0x2a8] ss:$24 sps:$4 sm:$0xff]  }
  0xca   :  { %2509 = vmatmul.mubr.bf16.vlgmr.msra.gmra.mrb[0].mxu1 %v4229_v16 }
  0xcb   :  { %2591 = vmatmul.mubr.bf16.vlgmr.msra.gmra.mrb[0].mxu0 %v4233_v17  ;;  %2600 = vmatpush1.bf16.msra.mxu1 %v3607_v18  ;;  %v3694_v18 = vld [vmem:[#allocation5 + $0x2b0] ss:$24 sps:$4 sm:$0xff]  }
  0xcc   :  { %2764 = vmatpush1.bf16.msra.mxu0 %v3610_v19  ;;  %2601 = vmatprep.subr.bf16.mxu1 %v3615_v20  ;;  %v3699_v19 = vld [vmem:[#allocation5 + $0x2dc] ss:$24 sps:$4 sm:$0xff]  }
  0xcd   :  { %2765 = vmatprep.subr.bf16.mxu0 %v3618_v21  ;;  %2631 = vmatprep.mubr.bf16.mxu1 %v4201_v48  ;;  %v3702_v20 = vld [vmem:[#allocation5 + $0x2e4] ss:$24 sps:$4 sm:$0xff]   ;;  %v3697_v21 = vld [vmem:[#allocation5 + $0x2d8] ss:$24 sps:$4 sm:$0xff]  }
  0xce   :  { %2795 = vmatprep.mubr.bf16.mxu0 %v4201_v48  ;;  %v3639_v48 = vld [vmem:[#allocation5 + $0xfc] ss:$24 sps:$4 sm:$0xff]  }
  0xcf   :  { %2602 = vmatpush1.bf16.msra.mxu1 %v3613_v22  ;;  %v3700_v22 = vld [vmem:[#allocation5 + $0x2e0] ss:$24 sps:$4 sm:$0xff]  }
  0xd0   :  { %2766 = vmatpush1.bf16.msra.mxu0 %v3616_v23  ;;  %2603 = vmatprep.subr.bf16.mxu1 %v3621_v24  ;;  %v3705_v23 = vld [vmem:[#allocation5 + $0x30c] ss:$24 sps:$4 sm:$0xff]  }
  0xd1   :  { %2767 = vmatprep.subr.bf16.mxu0 %v3624_v25  ;;  %v3708_v24 = vld [vmem:[#allocation5 + $0x314] ss:$24 sps:$4 sm:$0xff]   ;;  %v3703_v25 = vld [vmem:[#allocation5 + $0x308] ss:$24 sps:$4 sm:$0xff]  }
  0xd3   :  { %2604 = vmatpush1.bf16.msra.mxu1 %v3619_v26  ;;  %v3706_v26 = vld [vmem:[#allocation5 + $0x310] ss:$24 sps:$4 sm:$0xff]  }
  0xd4   :  { %2768 = vmatpush1.bf16.msra.mxu0 %v3622_v27  ;;  %2605 = vmatprep.subr.bf16.mxu1 %v3627_v28  ;;  %v3711_v27 = vld [vmem:[#allocation5 + $0x33c] ss:$24 sps:$4 sm:$0xff]  }
  0xd5   :  { %2769 = vmatprep.subr.bf16.mxu0 %v3630_v29  ;;  %v3714_v28 = vld [vmem:[#allocation5 + $0x344] ss:$24 sps:$4 sm:$0xff]   ;;  %v3709_v29 = vld [vmem:[#allocation5 + $0x338] ss:$24 sps:$4 sm:$0xff]  }
  0xd7   :  { %2606 = vmatpush1.bf16.msra.mxu1 %v3625_v30  ;;  %v3712_v30 = vld [vmem:[#allocation5 + $0x340] ss:$24 sps:$4 sm:$0xff]  }
  0xd8   :  { %2770 = vmatpush1.bf16.msra.mxu0 %v3628_v31  ;;  %2607 = vmatprep.subr.bf16.mxu1 %v3633_v32  ;;  %v3717_v31 = vld [vmem:[#allocation5 + $0x36c] ss:$24 sps:$4 sm:$0xff]  }
  0xd9   :  { %2771 = vmatprep.subr.bf16.mxu0 %v3636_v33  ;;  %v3720_v32 = vld [vmem:[#allocation5 + $0x374] ss:$24 sps:$4 sm:$0xff]   ;;  %v3715_v33 = vld [vmem:[#allocation5 + $0x368] ss:$24 sps:$4 sm:$0xff]  }
  0xdb   :  { %2608 = vmatpush1.bf16.msra.mxu1 %v3631_v34  ;;  %v3718_v34 = vld [vmem:[#allocation5 + $0x370] ss:$24 sps:$4 sm:$0xff]  }
  0xdc   :  { %2772 = vmatpush1.bf16.msra.mxu0 %v3634_v35  ;;  %2609 = vmatprep.subr.bf16.mxu1 %v3639_v48  ;;  %v3723_v35 = vld [vmem:[#allocation5 + $0x39c] ss:$24 sps:$4 sm:$0xff]   ;;  %v3721_v48 = vld [vmem:[#allocation5 + $0x398] ss:$24 sps:$4 sm:$0xff]  }
  0xdd   :  { %2773 = vmatprep.subr.bf16.mxu0 %v3642_v38  ;;  %v3724_v38 = vld [vmem:[#allocation5 + $0x3a0] ss:$24 sps:$4 sm:$0xff]  }
  0xdf   :  { %2610 = vmatpush1.bf16.msra.mxu1 %v3637_v39  ;;  %v3729_v39 = vld [vmem:[#allocation5 + $0x3cc] ss:$24 sps:$4 sm:$0xff]  }
  0xe0   :  { %2774 = vmatpush1.bf16.msra.mxu0 %v3640_v40  ;;  %2611 = vmatprep.subr.bf16.mxu1 %v3645_v41  ;;  %v3732_v40 = vld [vmem:[#allocation5 + $0x3d4] ss:$24 sps:$4 sm:$0xff]   ;;  %v3727_v41 = vld [vmem:[#allocation5 + $0x3c8] ss:$24 sps:$4 sm:$0xff]  }
  0xe1   :  { %2775 = vmatprep.subr.bf16.mxu0 %v3648_v42  ;;  %v3730_v42 = vld [vmem:[#allocation5 + $0x3d0] ss:$24 sps:$4 sm:$0xff]  }
  0xe3   :  { %2612 = vmatpush1.bf16.msra.mxu1 %v3643_v43  ;;  %v3738_v43 = vld [vmem:[#allocation5 + $0x404] ss:$24 sps:$4 sm:$0xff]  }
  0xe4   :  { %2776 = vmatpush1.bf16.msra.mxu0 %v3646_v44  ;;  %2613 = vmatprep.subr.bf16.mxu1 %v3651_v45  ;;  %v3733_v44 = vld [vmem:[#allocation5 + $0x3f8] ss:$24 sps:$4 sm:$0xff]  }
  0xe5   :  { %2777 = vmatprep.subr.bf16.mxu0 %v3654_v46  ;;  %v3736_v45 = vld [vmem:[#allocation5 + $0x400] ss:$24 sps:$4 sm:$0xff]   ;;  %v3741_v46 = vld [vmem:[#allocation5 + $0x42c] ss:$24 sps:$4 sm:$0xff]  }
  0xe7   :  { %2614 = vmatpush1.bf16.msra.mxu1 %v3649_v47  ;;  %v3744_v47 = vld [vmem:[#allocation5 + $0x434] ss:$24 sps:$4 sm:$0xff]  }
  0xe8   :  { %2778 = vmatpush1.bf16.msra.mxu0 %v3652_v49  ;;  %2615 = vmatprep.subr.bf16.mxu1 %v3657_v50  ;;  %v3739_v49 = vld [vmem:[#allocation5 + $0x428] ss:$24 sps:$4 sm:$0xff]  }
  0xe9   :  { %2779 = vmatprep.subr.bf16.mxu0 %v3660_v51  ;;  %v3742_v50 = vld [vmem:[#allocation5 + $0x430] ss:$24 sps:$4 sm:$0xff]   ;;  %v3747_v51 = vld [vmem:[#allocation5 + $0x45c] ss:$24 sps:$4 sm:$0xff]  }
  0xeb   :  { %2616 = vmatpush1.bf16.msra.mxu1 %v3655_v52  ;;  %v3750_v52 = vld [vmem:[#allocation5 + $0x464] ss:$24 sps:$4 sm:$0xff]  }
  0xec   :  { %2780 = vmatpush1.bf16.msra.mxu0 %v3658_v54  ;;  %2617 = vmatprep.subr.bf16.mxu1 %v3663_v55  ;;  %v3745_v54 = vld [vmem:[#allocation5 + $0x458] ss:$24 sps:$4 sm:$0xff]  }
  0xed   :  { %2781 = vmatprep.subr.bf16.mxu0 %v3666_v56  ;;  %v3748_v55 = vld [vmem:[#allocation5 + $0x460] ss:$24 sps:$4 sm:$0xff]   ;;  %v3753_v56 = vld [vmem:[#allocation5 + $0x48c] ss:$24 sps:$4 sm:$0xff]  }
  0xef   :  { %2618 = vmatpush1.bf16.msra.mxu1 %v3661_v57  ;;  %v3756_v57 = vld [vmem:[#allocation5 + $0x494] ss:$24 sps:$4 sm:$0xff]  }
  0xf0   :  { %2782 = vmatpush1.bf16.msra.mxu0 %v3664_v58  ;;  %2619 = vmatprep.subr.bf16.mxu1 %v3669_v59  ;;  %v3751_v58 = vld [vmem:[#allocation5 + $0x488] ss:$24 sps:$4 sm:$0xff]  }
  0xf1   :  { %2783 = vmatprep.subr.bf16.mxu0 %v3672_v60  ;;  %v3754_v59 = vld [vmem:[#allocation5 + $0x490] ss:$24 sps:$4 sm:$0xff]   ;;  %v3759_v60 = vld [vmem:[#allocation5 + $0x4bc] ss:$24 sps:$4 sm:$0xff]  }
  0xf3   :  { %2620 = vmatpush1.bf16.msra.mxu1 %v3667_v61  ;;  %v3762_v61 = vld [vmem:[#allocation5 + $0x4c4] ss:$24 sps:$4 sm:$0xff]  }
  0xf4   :  { %2784 = vmatpush1.bf16.msra.mxu0 %v3670_v62  ;;  %2621 = vmatprep.subr.bf16.mxu1 %v3675_v63  ;;  %v3757_v62 = vld [vmem:[#allocation5 + $0x4b8] ss:$24 sps:$4 sm:$0xff]  }
  0xf5   :  { %2785 = vmatprep.subr.bf16.mxu0 %v3678_v0  ;;  %v3760_v63 = vld [vmem:[#allocation5 + $0x4c0] ss:$24 sps:$4 sm:$0xff]   ;;  %v3765_v0 = vld [vmem:[#allocation5 + $0x4ec] ss:$24 sps:$4 sm:$0xff]  }
  0xf7   :  { %2622 = vmatpush1.bf16.msra.mxu1 %v3673_v1  ;;  %v3768_v1 = vld [vmem:[#allocation5 + $0x4f4] ss:$24 sps:$4 sm:$0xff]  }
  0xf8   :  { %2786 = vmatpush1.bf16.msra.mxu0 %v3676_v2  ;;  %2623 = vmatprep.subr.bf16.mxu1 %v3681_v3  ;;  %v3763_v2 = vld [vmem:[#allocation5 + $0x4e8] ss:$24 sps:$4 sm:$0xff]  }
  0xf9   :  { %2787 = vmatprep.subr.bf16.mxu0 %v3684_v4  ;;  %v3766_v3 = vld [vmem:[#allocation5 + $0x4f0] ss:$24 sps:$4 sm:$0xff]   ;;  %v3771_v4 = vld [vmem:[#allocation5 + $0x51c] ss:$24 sps:$4 sm:$0xff]  }
  0xfb   :  { %2624 = vmatpush1.bf16.msra.mxu1 %v3679_v5  ;;  %v3774_v5 = vld [vmem:[#allocation5 + $0x524] ss:$24 sps:$4 sm:$0xff]  }
  0xfc   :  { %2788 = vmatpush1.bf16.msra.mxu0 %v3682_v8  ;;  %2625 = vmatprep.subr.bf16.mxu1 %v3687_v9  ;;  %v3769_v8 = vld [vmem:[#allocation5 + $0x518] ss:$24 sps:$4 sm:$0xff]  }
  0xfd   :  { %2789 = vmatprep.subr.bf16.mxu0 %v3690_v10  ;;  %v3772_v9 = vld [vmem:[#allocation5 + $0x520] ss:$24 sps:$4 sm:$0xff]   ;;  %v3777_v10 = vld [vmem:[#allocation5 + $0x54c] ss:$24 sps:$4 sm:$0xff]  }
  0xff   :  { %2626 = vmatpush1.bf16.msra.mxu1 %v3685_v11  ;;  %v3780_v11 = vld [vmem:[#allocation5 + $0x554] ss:$24 sps:$4 sm:$0xff]  }
 0x100   :  { %2790 = vmatpush1.bf16.msra.mxu0 %v3688_v12  ;;  %2627 = vmatprep.subr.bf16.mxu1 %v3693_v13  ;;  %v3775_v12 = vld [vmem:[#allocation5 + $0x548] ss:$24 sps:$4 sm:$0xff]  }
 0x101   :  { %2791 = vmatprep.subr.bf16.mxu0 %v3696_v14  ;;  %v3778_v13 = vld [vmem:[#allocation5 + $0x550] ss:$24 sps:$4 sm:$0xff]   ;;  %v3783_v14 = vld [vmem:[#allocation5 + $0x57c] ss:$24 sps:$4 sm:$0xff]  }
 0x103   :  { %2628 = vmatpush1.bf16.msra.mxu1 %v3691_v15  ;;  %v3786_v15 = vld [vmem:[#allocation5 + $0x584] ss:$24 sps:$4 sm:$0xff]  }
 0x104   :  { %2792 = vmatpush1.bf16.msra.mxu0 %v3694_v18  ;;  %2629 = vmatprep.subr.bf16.mxu1 %v3699_v19  ;;  %v3781_v18 = vld [vmem:[#allocation5 + $0x578] ss:$24 sps:$4 sm:$0xff]  }
 0x105   :  { %2793 = vmatprep.subr.bf16.mxu0 %v3702_v20  ;;  %v3784_v19 = vld [vmem:[#allocation5 + $0x580] ss:$24 sps:$4 sm:$0xff]   ;;  %v3789_v20 = vld [vmem:[#allocation5 + $0x5ac] ss:$24 sps:$4 sm:$0xff]  }
 0x107   :  { %2630 = vmatpush1.bf16.msra.mxu1 %v3697_v21  ;;  %v3792_v21 = vld [vmem:[#allocation5 + $0x5b4] ss:$24 sps:$4 sm:$0xff]  }
 0x108   :  { %2794 = vmatpush1.bf16.msra.mxu0 %v3700_v22  ;;  %2640 = vmatprep.subr.bf16.mxu1 %v3705_v23  ;;  %v3787_v22 = vld [vmem:[#allocation5 + $0x5a8] ss:$24 sps:$4 sm:$0xff]  }
 0x109   :  { %2804 = vmatprep.subr.bf16.mxu0 %v3708_v24  ;;  %v3790_v23 = vld [vmem:[#allocation5 + $0x5b0] ss:$24 sps:$4 sm:$0xff]   ;;  %v3795_v24 = vld [vmem:[#allocation5 + $0x5dc] ss:$24 sps:$4 sm:$0xff]  }
 0x10a   :  { %2632 = vmatmul.mubr.bf16.vlgmr.msra.gmra.mrb[4].mxu1 %v4207_v6 }
 0x10b   :  { %2796 = vmatmul.mubr.bf16.vlgmr.msra.gmra.mrb[4].mxu0 %v4207_v6  ;;  %2641 = vmatpush1.bf16.msra.mxu1 %v3703_v25  ;;  %v3726_v6 = vld [vmem:[#allocation5 + $0x3a4] ss:$24 sps:$4 sm:$0xff]  }
 0x10c   :  { %2805 = vmatpush1.bf16.msra.mxu0 %v3706_v26  ;;  %2642 = vmatprep.subr.bf16.mxu1 %v3711_v27  ;;  %v3798_v25 = vld [vmem:[#allocation5 + $0x5e4] ss:$24 sps:$4 sm:$0xff]   ;;  %v3793_v26 = vld [vmem:[#allocation5 + $0x5d8] ss:$24 sps:$4 sm:$0xff]  }
 0x10d   :  { %2806 = vmatprep.subr.bf16.mxu0 %v3714_v28  ;;  %2672 = vmatprep.mubr.bf16.mxu1 %v4219_v36  ;;  %v3796_v27 = vld [vmem:[#allocation5 + $0x5e0] ss:$24 sps:$4 sm:$0xff]   ;;  %v3801_v28 = vld [vmem:[#allocation5 + $0x60c] ss:$24 sps:$4 sm:$0xff]  }
 0x10e   :  { %2836 = vmatprep.mubr.bf16.mxu0 %v4219_v36  ;;  %v3735_v36 = vld [vmem:[#allocation5 + $0x3fc] ss:$24 sps:$4 sm:$0xff]  }
 0x10f   :  { %2643 = vmatpush1.bf16.msra.mxu1 %v3709_v29  ;;  %v3804_v29 = vld [vmem:[#allocation5 + $0x614] ss:$24 sps:$4 sm:$0xff]  }
 0x110   :  { %2807 = vmatpush1.bf16.msra.mxu0 %v3712_v30  ;;  %2644 = vmatprep.subr.bf16.mxu1 %v3717_v31  ;;  %v3799_v30 = vld [vmem:[#allocation5 + $0x608] ss:$24 sps:$4 sm:$0xff]  }
 0x111   :  { %2808 = vmatprep.subr.bf16.mxu0 %v3720_v32  ;;  %v3802_v31 = vld [vmem:[#allocation5 + $0x610] ss:$24 sps:$4 sm:$0xff]   ;;  %v3807_v32 = vld [vmem:[#allocation5 + $0x63c] ss:$24 sps:$4 sm:$0xff]  }
 0x113   :  { %2645 = vmatpush1.bf16.msra.mxu1 %v3715_v33  ;;  %v3810_v33 = vld [vmem:[#allocation5 + $0x644] ss:$24 sps:$4 sm:$0xff]  }
 0x114   :  { %2809 = vmatpush1.bf16.msra.mxu0 %v3718_v34  ;;  %2646 = vmatprep.subr.bf16.mxu1 %v3723_v35  ;;  %v3805_v34 = vld [vmem:[#allocation5 + $0x638] ss:$24 sps:$4 sm:$0xff]  }
 0x115   :  { %2810 = vmatprep.subr.bf16.mxu0 %v3726_v6  ;;  %v3808_v35 = vld [vmem:[#allocation5 + $0x640] ss:$24 sps:$4 sm:$0xff]   ;;  %v3813_v6 = vld [vmem:[#allocation5 + $0x66c] ss:$24 sps:$4 sm:$0xff]  }
 0x117   :  { %2647 = vmatpush1.bf16.msra.mxu1 %v3721_v48  ;;  %v3816_v48 = vld [vmem:[#allocation5 + $0x674] ss:$24 sps:$4 sm:$0xff]  }
 0x118   :  { %2811 = vmatpush1.bf16.msra.mxu0 %v3724_v38  ;;  %2648 = vmatprep.subr.bf16.mxu1 %v3729_v39  ;;  %v3811_v38 = vld [vmem:[#allocation5 + $0x668] ss:$24 sps:$4 sm:$0xff]  }
 0x119   :  { %2812 = vmatprep.subr.bf16.mxu0 %v3732_v40  ;;  %v3814_v39 = vld [vmem:[#allocation5 + $0x670] ss:$24 sps:$4 sm:$0xff]   ;;  %v3819_v40 = vld [vmem:[#allocation5 + $0x69c] ss:$24 sps:$4 sm:$0xff]  }
 0x11b   :  { %2649 = vmatpush1.bf16.msra.mxu1 %v3727_v41  ;;  %v3817_v41 = vld [vmem:[#allocation5 + $0x698] ss:$24 sps:$4 sm:$0xff]  }
 0x11c   :  { %2813 = vmatpush1.bf16.msra.mxu0 %v3730_v42  ;;  %2650 = vmatprep.subr.bf16.mxu1 %v3735_v36  ;;  %v3820_v42 = vld [vmem:[#allocation5 + $0x6a0] ss:$24 sps:$4 sm:$0xff]   ;;  %v3825_v36 = vld [vmem:[#allocation5 + $0x6cc] ss:$24 sps:$4 sm:$0xff]  }
 0x11d   :  { %2814 = vmatprep.subr.bf16.mxu0 %v3738_v43  ;;  %v3828_v43 = vld [vmem:[#allocation5 + $0x6d4] ss:$24 sps:$4 sm:$0xff]  }
 0x11f   :  { %2651 = vmatpush1.bf16.msra.mxu1 %v3733_v44  ;;  %v3823_v44 = vld [vmem:[#allocation5 + $0x6c8] ss:$24 sps:$4 sm:$0xff]  }
 0x120   :  { %2815 = vmatpush1.bf16.msra.mxu0 %v3736_v45  ;;  %2652 = vmatprep.subr.bf16.mxu1 %v3741_v46  ;;  %v3831_v45 = vld [vmem:[#allocation5 + $0x6fc] ss:$24 sps:$4 sm:$0xff]  }
 0x121   :  { %2816 = vmatprep.subr.bf16.mxu0 %v3744_v47  ;;  %v3834_v46 = vld [vmem:[#allocation5 + $0x704] ss:$24 sps:$4 sm:$0xff]   ;;  %v3829_v47 = vld [vmem:[#allocation5 + $0x6f8] ss:$24 sps:$4 sm:$0xff]  }
 0x123   :  { %2653 = vmatpush1.bf16.msra.mxu1 %v3739_v49  ;;  %v3832_v49 = vld [vmem:[#allocation5 + $0x700] ss:$24 sps:$4 sm:$0xff]  }
 0x124   :  { %2817 = vmatpush1.bf16.msra.mxu0 %v3742_v50  ;;  %2654 = vmatprep.subr.bf16.mxu1 %v3747_v51  ;;  %v3837_v50 = vld [vmem:[#allocation5 + $0x72c] ss:$24 sps:$4 sm:$0xff]  }
 0x125   :  { %2818 = vmatprep.subr.bf16.mxu0 %v3750_v52  ;;  %v3840_v51 = vld [vmem:[#allocation5 + $0x734] ss:$24 sps:$4 sm:$0xff]   ;;  %v3835_v52 = vld [vmem:[#allocation5 + $0x728] ss:$24 sps:$4 sm:$0xff]  }
 0x127   :  { %2655 = vmatpush1.bf16.msra.mxu1 %v3745_v54  ;;  %v3838_v54 = vld [vmem:[#allocation5 + $0x730] ss:$24 sps:$4 sm:$0xff]  }
 0x128   :  { %2819 = vmatpush1.bf16.msra.mxu0 %v3748_v55  ;;  %2656 = vmatprep.subr.bf16.mxu1 %v3753_v56  ;;  %v3843_v55 = vld [vmem:[#allocation5 + $0x75c] ss:$24 sps:$4 sm:$0xff]  }
 0x129   :  { %2820 = vmatprep.subr.bf16.mxu0 %v3756_v57  ;;  %v3846_v56 = vld [vmem:[#allocation5 + $0x764] ss:$24 sps:$4 sm:$0xff]   ;;  %v3841_v57 = vld [vmem:[#allocation5 + $0x758] ss:$24 sps:$4 sm:$0xff]  }
 0x12b   :  { %2657 = vmatpush1.bf16.msra.mxu1 %v3751_v58  ;;  %v3844_v58 = vld [vmem:[#allocation5 + $0x760] ss:$24 sps:$4 sm:$0xff]  }
 0x12c   :  { %2821 = vmatpush1.bf16.msra.mxu0 %v3754_v59  ;;  %2658 = vmatprep.subr.bf16.mxu1 %v3759_v60  ;;  %v3849_v59 = vld [vmem:[#allocation5 + $0x78c] ss:$24 sps:$4 sm:$0xff]  }
 0x12d   :  { %2822 = vmatprep.subr.bf16.mxu0 %v3762_v61  ;;  %v3852_v60 = vld [vmem:[#allocation5 + $0x794] ss:$24 sps:$4 sm:$0xff]   ;;  %v3847_v61 = vld [vmem:[#allocation5 + $0x788] ss:$24 sps:$4 sm:$0xff]  }
 0x12f   :  { %2659 = vmatpush1.bf16.msra.mxu1 %v3757_v62  ;;  %v3850_v62 = vld [vmem:[#allocation5 + $0x790] ss:$24 sps:$4 sm:$0xff]  }
 0x130   :  { %2823 = vmatpush1.bf16.msra.mxu0 %v3760_v63  ;;  %2660 = vmatprep.subr.bf16.mxu1 %v3765_v0  ;;  %v3855_v63 = vld [vmem:[#allocation5 + $0x7bc] ss:$24 sps:$4 sm:$0xff]  }
 0x131   :  { %2824 = vmatprep.subr.bf16.mxu0 %v3768_v1  ;;  %v3858_v0 = vld [vmem:[#allocation5 + $0x7c4] ss:$24 sps:$4 sm:$0xff]   ;;  %v3853_v1 = vld [vmem:[#allocation5 + $0x7b8] ss:$24 sps:$4 sm:$0xff]  }
 0x133   :  { %2661 = vmatpush1.bf16.msra.mxu1 %v3763_v2  ;;  %v3856_v2 = vld [vmem:[#allocation5 + $0x7c0] ss:$24 sps:$4 sm:$0xff]  }
 0x134   :  { %2825 = vmatpush1.bf16.msra.mxu0 %v3766_v3  ;;  %2662 = vmatprep.subr.bf16.mxu1 %v3771_v4  ;;  %v3861_v3 = vld [vmem:[#allocation5 + $0x7ec] ss:$24 sps:$4 sm:$0xff]  }
 0x135   :  { %2826 = vmatprep.subr.bf16.mxu0 %v3774_v5  ;;  %v3864_v4 = vld [vmem:[#allocation5 + $0x7f4] ss:$24 sps:$4 sm:$0xff]   ;;  %v3859_v5 = vld [vmem:[#allocation5 + $0x7e8] ss:$24 sps:$4 sm:$0xff]  }
 0x137   :  { %2663 = vmatpush1.bf16.msra.mxu1 %v3769_v8  ;;  %v3862_v8 = vld [vmem:[#allocation5 + $0x7f0] ss:$24 sps:$4 sm:$0xff]  }
 0x138   :  { %2827 = vmatpush1.bf16.msra.mxu0 %v3772_v9  ;;  %2664 = vmatprep.subr.bf16.mxu1 %v3777_v10  ;;  %v3867_v9 = vld [vmem:[#allocation5 + $0x81c] ss:$24 sps:$4 sm:$0xff]  }
 0x139   :  { %2828 = vmatprep.subr.bf16.mxu0 %v3780_v11  ;;  %v3870_v10 = vld [vmem:[#allocation5 + $0x824] ss:$24 sps:$4 sm:$0xff]   ;;  %v3865_v11 = vld [vmem:[#allocation5 + $0x818] ss:$24 sps:$4 sm:$0xff]  }
 0x13b   :  { %2665 = vmatpush1.bf16.msra.mxu1 %v3775_v12  ;;  %v3868_v12 = vld [vmem:[#allocation5 + $0x820] ss:$24 sps:$4 sm:$0xff]  }
 0x13c   :  { %2829 = vmatpush1.bf16.msra.mxu0 %v3778_v13  ;;  %2666 = vmatprep.subr.bf16.mxu1 %v3783_v14  ;;  %v3873_v13 = vld [vmem:[#allocation5 + $0x84c] ss:$24 sps:$4 sm:$0xff]  }
 0x13d   :  { %2830 = vmatprep.subr.bf16.mxu0 %v3786_v15  ;;  %v3876_v14 = vld [vmem:[#allocation5 + $0x854] ss:$24 sps:$4 sm:$0xff]   ;;  %v3871_v15 = vld [vmem:[#allocation5 + $0x848] ss:$24 sps:$4 sm:$0xff]  }
 0x13f   :  { %2667 = vmatpush1.bf16.msra.mxu1 %v3781_v18  ;;  %v3874_v18 = vld [vmem:[#allocation5 + $0x850] ss:$24 sps:$4 sm:$0xff]  }
 0x140   :  { %2831 = vmatpush1.bf16.msra.mxu0 %v3784_v19  ;;  %2668 = vmatprep.subr.bf16.mxu1 %v3789_v20  ;;  %v3879_v19 = vld [vmem:[#allocation5 + $0x87c] ss:$24 sps:$4 sm:$0xff]  }
 0x141   :  { %2832 = vmatprep.subr.bf16.mxu0 %v3792_v21  ;;  %v3882_v20 = vld [vmem:[#allocation5 + $0x884] ss:$24 sps:$4 sm:$0xff]   ;;  %v3877_v21 = vld [vmem:[#allocation5 + $0x878] ss:$24 sps:$4 sm:$0xff]  }
 0x143   :  { %2669 = vmatpush1.bf16.msra.mxu1 %v3787_v22  ;;  %v3880_v22 = vld [vmem:[#allocation5 + $0x880] ss:$24 sps:$4 sm:$0xff]  }
 0x144   :  { %2833 = vmatpush1.bf16.msra.mxu0 %v3790_v23  ;;  %2670 = vmatprep.subr.bf16.mxu1 %v3795_v24  ;;  %v3885_v23 = vld [vmem:[#allocation5 + $0x8ac] ss:$24 sps:$4 sm:$0xff]  }
 0x145   :  { %2834 = vmatprep.subr.bf16.mxu0 %v3798_v25  ;;  %v3888_v24 = vld [vmem:[#allocation5 + $0x8b4] ss:$24 sps:$4 sm:$0xff]   ;;  %v3883_v25 = vld [vmem:[#allocation5 + $0x8a8] ss:$24 sps:$4 sm:$0xff]  }
 0x147   :  { %2671 = vmatpush1.bf16.msra.mxu1 %v3793_v26  ;;  %v3886_v26 = vld [vmem:[#allocation5 + $0x8b0] ss:$24 sps:$4 sm:$0xff]  }
 0x148   :  { %2835 = vmatpush1.bf16.msra.mxu0 %v3796_v27  ;;  %2681 = vmatprep.subr.bf16.mxu1 %v3801_v28  ;;  %v3891_v27 = vld [vmem:[#allocation5 + $0x8dc] ss:$24 sps:$4 sm:$0xff]  }
 0x149   :  { %2845 = vmatprep.subr.bf16.mxu0 %v3804_v29  ;;  %v3894_v28 = vld [vmem:[#allocation5 + $0x8e4] ss:$24 sps:$4 sm:$0xff]   ;;  %v3889_v29 = vld [vmem:[#allocation5 + $0x8d8] ss:$24 sps:$4 sm:$0xff]  }
 0x14a   :  { %2673 = vmatmul.mubr.bf16.vlgmr.msra.gmra.mrb[4].mxu1 %v4229_v16 }
 0x14b   :  { %2837 = vmatmul.mubr.bf16.vlgmr.msra.gmra.mrb[4].mxu0 %v4229_v16  ;;  %2682 = vmatpush1.bf16.msra.mxu1 %v3799_v30  ;;  %v3822_v16 = vld [vmem:[#allocation5 + $0x6a4] ss:$24 sps:$4 sm:$0xff]   ;;  %v3892_v30 = vld [vmem:[#allocation5 + $0x8e0] ss:$24 sps:$4 sm:$0xff]  }
 0x14c   :  { %2846 = vmatpush1.bf16.msra.mxu0 %v3802_v31  ;;  %2683 = vmatprep.subr.bf16.mxu1 %v3807_v32  ;;  %v3897_v31 = vld [vmem:[#allocation5 + $0x90c] ss:$24 sps:$4 sm:$0xff]  }
 0x14d   :  { %2847 = vmatprep.subr.bf16.mxu0 %v3810_v33  ;;  %2713 = vmatprep.mubr.bf16.mxu1 %v4203_v53  ;;  %v3900_v32 = vld [vmem:[#allocation5 + $0x914] ss:$24 sps:$4 sm:$0xff]   ;;  %v3895_v33 = vld [vmem:[#allocation5 + $0x908] ss:$24 sps:$4 sm:$0xff]  }
 0x14e   :  { %2877 = vmatprep.mubr.bf16.mxu0 %v4203_v53  ;;  %v3826_v53 = vld [vmem:[#allocation5 + $0x6d0] ss:$24 sps:$4 sm:$0xff]  }
 0x14f   :  { %2684 = vmatpush1.bf16.msra.mxu1 %v3805_v34  ;;  %v3898_v34 = vld [vmem:[#allocation5 + $0x910] ss:$24 sps:$4 sm:$0xff]  }
 0x150   :  { %2848 = vmatpush1.bf16.msra.mxu0 %v3808_v35  ;;  %2685 = vmatprep.subr.bf16.mxu1 %v3813_v6  ;;  %v3903_v35 = vld [vmem:[#allocation5 + $0x93c] ss:$24 sps:$4 sm:$0xff]  }
 0x151   :  { %2849 = vmatprep.subr.bf16.mxu0 %v3816_v48  ;;  %v3906_v6 = vld [vmem:[#allocation5 + $0x944] ss:$24 sps:$4 sm:$0xff]   ;;  %v3901_v48 = vld [vmem:[#allocation5 + $0x938] ss:$24 sps:$4 sm:$0xff]  }
 0x153   :  { %2686 = vmatpush1.bf16.msra.mxu1 %v3811_v38  ;;  %v3904_v38 = vld [vmem:[#allocation5 + $0x940] ss:$24 sps:$4 sm:$0xff]  }
 0x154   :  { %2850 = vmatpush1.bf16.msra.mxu0 %v3814_v39  ;;  %2687 = vmatprep.subr.bf16.mxu1 %v3819_v40  ;;  %v3909_v39 = vld [vmem:[#allocation5 + $0x96c] ss:$24 sps:$4 sm:$0xff]  }
 0x155   :  { %2851 = vmatprep.subr.bf16.mxu0 %v3822_v16  ;;  %v3912_v40 = vld [vmem:[#allocation5 + $0x974] ss:$24 sps:$4 sm:$0xff]   ;;  %v457_v16 = vlaneseq }
 0x157   :  { %2688 = vmatpush1.bf16.msra.mxu1 %v3817_v41  ;;  %v3907_v41 = vld [vmem:[#allocation5 + $0x968] ss:$24 sps:$4 sm:$0xff]  }
 0x158   :  { %2852 = vmatpush1.bf16.msra.mxu0 %v3820_v42  ;;  %2689 = vmatprep.subr.bf16.mxu1 %v3825_v36  ;;  %v3910_v42 = vld [vmem:[#allocation5 + $0x970] ss:$24 sps:$4 sm:$0xff]   ;;  %v3918_v36 = vld [vmem:[#allocation5 + $0x9a4] ss:$24 sps:$4 sm:$0xff]  }
 0x159   :  { %2853 = vmatprep.subr.bf16.mxu0 %v3828_v43  ;;  %v4251_v43 = vshrl.u32 %v457_v16, 7  ;;  %v3969_v16 = vld [vmem:[#allocation5 + $0xb4c] ss:$24 sps:$4 sm:$0xff]  }
 0x15b   :  { %2690 = vmatpush1.bf16.msra.mxu1 %v3823_v44  ;;  %v3913_v44 = vld [vmem:[#allocation5 + $0x998] ss:$24 sps:$4 sm:$0xff]  }
 0x15c   :  { %2854 = vmatpush1.bf16.msra.mxu0 %v3826_v53  ;;  %2691 = vmatprep.subr.bf16.mxu1 %v3831_v45  ;;  %v3916_v53 = vld [vmem:[#allocation5 + $0x9a0] ss:$24 sps:$4 sm:$0xff]   ;;  %v3921_v45 = vld [vmem:[#allocation5 + $0x9cc] ss:$24 sps:$4 sm:$0xff]  }
 0x15d   :  { %2855 = vmatprep.subr.bf16.mxu0 %v3834_v46  ;;  %v3924_v46 = vld [vmem:[#allocation5 + $0x9d4] ss:$24 sps:$4 sm:$0xff]  }
 0x15f   :  { %2692 = vmatpush1.bf16.msra.mxu1 %v3829_v47  ;;  %v463_v47 = vsub.s32 1, %v4251_v43 }
 0x160   :  { %2856 = vmatpush1.bf16.msra.mxu0 %v3832_v49  ;;  %2693 = vmatprep.subr.bf16.mxu1 %v3837_v50  ;;  %v3919_v49 = vld [vmem:[#allocation5 + $0x9c8] ss:$24 sps:$4 sm:$0xff]  }
 0x161   :  { %2857 = vmatprep.subr.bf16.mxu0 %v3840_v51  ;;  %v3922_v50 = vld [vmem:[#allocation5 + $0x9d0] ss:$24 sps:$4 sm:$0xff]   ;;  %v4255_v51 = vld [vmem:[#allocation7] sm:$0x3f] }
 0x163   :  { %2694 = vmatpush1.bf16.msra.mxu1 %v3835_v52  ;;  %v3927_v52 = vld [vmem:[#allocation5 + $0x9fc] ss:$24 sps:$4 sm:$0xff]  }
 0x164   :  { %2858 = vmatpush1.bf16.msra.mxu0 %v3838_v54  ;;  %2695 = vmatprep.subr.bf16.mxu1 %v3843_v55  ;;  %v3930_v54 = vld [vmem:[#allocation5 + $0xa04] ss:$24 sps:$4 sm:$0xff]  }
 0x165   :  { %2859 = vmatprep.subr.bf16.mxu0 %v3846_v56  ;;  %v464_v56 = vrot.slane %v4255_v51, %v463_v47  ;;  %v3979_v47 = vld [vmem:[#allocation5 + $0xba8] ss:$24 sps:$4 sm:$0xff]  }
 0x167   :  { %2696 = vmatpush1.bf16.msra.mxu1 %v3841_v57  ;;  %v3925_v57 = vld [vmem:[#allocation5 + $0x9f8] ss:$24 sps:$4 sm:$0xff]  }
 0x168   :  { %2860 = vmatpush1.bf16.msra.mxu0 %v3844_v58  ;;  %2697 = vmatprep.subr.bf16.mxu1 %v3849_v59  ;;  %v3928_v58 = vld [vmem:[#allocation5 + $0xa00] ss:$24 sps:$4 sm:$0xff]   ;;  %v3933_v59 = vld [vmem:[#allocation5 + $0xa2c] ss:$24 sps:$4 sm:$0xff]  }
 0x169   :  { %2861 = vmatprep.subr.bf16.mxu0 %v3852_v60  ;;  %v3936_v60 = vld [vmem:[#allocation5 + $0xa34] ss:$24 sps:$4 sm:$0xff]  }
 0x16b   :  { %2698 = vmatpush1.bf16.msra.mxu1 %v3847_v61 }
 0x16c   :  { %2862 = vmatpush1.bf16.msra.mxu0 %v3850_v62  ;;  %2699 = vmatprep.subr.bf16.mxu1 %v3855_v63 }
 0x16d   :  { %2863 = vmatprep.subr.bf16.mxu0 %v3858_v0 }
 0x16f   :  { %2700 = vmatpush1.bf16.msra.mxu1 %v3853_v1 }
 0x170   :  { %2864 = vmatpush1.bf16.msra.mxu0 %v3856_v2  ;;  %2701 = vmatprep.subr.bf16.mxu1 %v3861_v3 }
 0x171   :  { %2865 = vmatprep.subr.bf16.mxu0 %v3864_v4 }
 0x173   :  { %2702 = vmatpush1.bf16.msra.mxu1 %v3859_v5  ;;  %v3931_v5 = vld [vmem:[#allocation5 + $0xa28] ss:$24 sps:$4 sm:$0xff]  }
 0x174   :  { %2866 = vmatpush1.bf16.msra.mxu0 %v3862_v8  ;;  %2703 = vmatprep.subr.bf16.mxu1 %v3867_v9  ;;  %v3934_v8 = vld [vmem:[#allocation5 + $0xa30] ss:$24 sps:$4 sm:$0xff]  }
 0x175   :  { %2867 = vmatprep.subr.bf16.mxu0 %v3870_v10 }
 0x177   :  { %2704 = vmatpush1.bf16.msra.mxu1 %v3865_v11 }
 0x178   :  { %2868 = vmatpush1.bf16.msra.mxu0 %v3868_v12  ;;  %2705 = vmatprep.subr.bf16.mxu1 %v3873_v13  ;;  %v3939_v12 = vld [vmem:[#allocation5 + $0xa5c] ss:$24 sps:$4 sm:$0xff]  }
 0x179   :  { %2869 = vmatprep.subr.bf16.mxu0 %v3876_v14  ;;  %v3942_v13 = vld [vmem:[#allocation5 + $0xa64] ss:$24 sps:$4 sm:$0xff]  }
 0x17b   :  { %2706 = vmatpush1.bf16.msra.mxu1 %v3871_v15  ;;  %v3937_v15 = vld [vmem:[#allocation5 + $0xa58] ss:$24 sps:$4 sm:$0xff]  }
 0x17c   :  { %2870 = vmatpush1.bf16.msra.mxu0 %v3874_v18  ;;  %2707 = vmatprep.subr.bf16.mxu1 %v3879_v19  ;;  %v3940_v18 = vld [vmem:[#allocation5 + $0xa60] ss:$24 sps:$4 sm:$0xff]   ;;  %v3945_v19 = vld [vmem:[#allocation5 + $0xa8c] ss:$24 sps:$4 sm:$0xff]  }
 0x17d   :  { %2871 = vmatprep.subr.bf16.mxu0 %v3882_v20  ;;  %v3948_v20 = vld [vmem:[#allocation5 + $0xa94] ss:$24 sps:$4 sm:$0xff]  }
 0x17f   :  { %2708 = vmatpush1.bf16.msra.mxu1 %v3877_v21  ;;  %v3943_v21 = vld [vmem:[#allocation5 + $0xa88] ss:$24 sps:$4 sm:$0xff]  }
 0x180   :  { %2872 = vmatpush1.bf16.msra.mxu0 %v3880_v22  ;;  %2709 = vmatprep.subr.bf16.mxu1 %v3885_v23  ;;  %v3946_v22 = vld [vmem:[#allocation5 + $0xa90] ss:$24 sps:$4 sm:$0xff]   ;;  %v3951_v23 = vld [vmem:[#allocation5 + $0xabc] ss:$24 sps:$4 sm:$0xff]  }
 0x181   :  { %2873 = vmatprep.subr.bf16.mxu0 %v3888_v24  ;;  %v3954_v24 = vld [vmem:[#allocation5 + $0xac4] ss:$24 sps:$4 sm:$0xff]  }
 0x183   :  { %2710 = vmatpush1.bf16.msra.mxu1 %v3883_v25  ;;  %v2933_v25 = vld [vmem:[#allocation8] sm:$0xff] }
 0x184   :  { %2874 = vmatpush1.bf16.msra.mxu0 %v3886_v26  ;;  %2711 = vmatprep.subr.bf16.mxu1 %v3891_v27  ;;  %v2934_v26 = vld [vmem:[#allocation8 + $0x8] sm:$0xff] }
 0x185   :  { %2875 = vmatprep.subr.bf16.mxu0 %v3894_v28  ;;  %v3949_v27 = vld [vmem:[#allocation5 + $0xab8] ss:$24 sps:$4 sm:$0xff]  }
 0x186   :  { %v3952_v28 = vld [vmem:[#allocation5 + $0xac0] ss:$24 sps:$4 sm:$0xff]  }
 0x187   :  { %2712 = vmatpush1.bf16.msra.mxu1 %v3889_v29 }
 0x188   :  { %2876 = vmatpush1.bf16.msra.mxu0 %v3892_v30  ;;  %2722 = vmatprep.subr.bf16.mxu1 %v3897_v31  ;;  %v3957_v30 = vld [vmem:[#allocation5 + $0xaec] ss:$24 sps:$4 sm:$0xff]  }
 0x189   :  { %2886 = vmatprep.subr.bf16.mxu0 %v3900_v32  ;;  %v3960_v31 = vld [vmem:[#allocation5 + $0xaf4] ss:$24 sps:$4 sm:$0xff]  }
 0x18a   :  { %2714 = vmatmul.mubr.bf16.vlgmr.msra.gmra.mrb[4].mxu1 %v4209_v7 }
 0x18b   :  { %2878 = vmatmul.mubr.bf16.vlgmr.msra.gmra.mrb[4].mxu0 %v4209_v7  ;;  %2723 = vmatpush1.bf16.msra.mxu1 %v3895_v33  ;;  %v3915_v7 = vld [vmem:[#allocation5 + $0x99c] ss:$24 sps:$4 sm:$0xff]  }
 0x18c   :  { %2887 = vmatpush1.bf16.msra.mxu0 %v3898_v34  ;;  %2724 = vmatprep.subr.bf16.mxu1 %v3903_v35  ;;  %v3955_v35 = vld [vmem:[#allocation5 + $0xae8] ss:$24 sps:$4 sm:$0xff]  }
 0x18d   :  { %2888 = vmatprep.subr.bf16.mxu0 %v3906_v6  ;;  %2754 = vmatprep.mubr.bf16.mxu1 %v4223_v37  ;;  %v3958_v6 = vld [vmem:[#allocation5 + $0xaf0] ss:$24 sps:$4 sm:$0xff]  }
 0x18e   :  { %2918 = vmatprep.mubr.bf16.mxu0 %v4223_v37  ;;  %v459_v37 = vsub.s32 0, %v4251_v43 }
 0x18f   :  { %2725 = vmatpush1.bf16.msra.mxu1 %v3901_v48  ;;  %v3963_v48 = vld [vmem:[#allocation5 + $0xb1c] ss:$24 sps:$4 sm:$0xff]  }
 0x190   :  { %2889 = vmatpush1.bf16.msra.mxu0 %v3904_v38  ;;  %2726 = vmatprep.subr.bf16.mxu1 %v3909_v39  ;;  %v460_v55 = vrot.slane %v4255_v51, %v459_v37  ;;  %v3966_v38 = vld [vmem:[#allocation5 + $0xb24] ss:$24 sps:$4 sm:$0xff]   ;;  %v3961_v39 = vld [vmem:[#allocation5 + $0xb18] ss:$24 sps:$4 sm:$0xff]   ;;  %v3984_v37 = vld [vmem:[#allocation5 + $0xbb4] ss:$24 sps:$4 sm:$0xff]  }
 0x191   :  { %2890 = vmatprep.subr.bf16.mxu0 %v3912_v40  ;;  %v3964_v40 = vld [vmem:[#allocation5 + $0xb20] ss:$24 sps:$4 sm:$0xff]  }
 0x193   :  { %2727 = vmatpush1.bf16.msra.mxu1 %v3907_v41  ;;  %v3972_v41 = vld [vmem:[#allocation5 + $0xb54] ss:$24 sps:$4 sm:$0xff]  }
 0x194   :  { %2891 = vmatpush1.bf16.msra.mxu0 %v3910_v42  ;;  %2728 = vmatprep.subr.bf16.mxu1 %v3915_v7  ;;  %v3967_v42 = vld [vmem:[#allocation5 + $0xb48] ss:$24 sps:$4 sm:$0xff]  }
 0x195   :  { %2892 = vmatprep.subr.bf16.mxu0 %v3918_v36  ;;  %v3970_v7 = vld [vmem:[#allocation5 + $0xb50] ss:$24 sps:$4 sm:$0xff]   ;;  %v3975_v36 = vld [vmem:[#allocation5 + $0xb7c] ss:$24 sps:$4 sm:$0xff]  }
 0x197   :  { %2729 = vmatpush1.bf16.msra.mxu1 %v3913_v44  ;;  %v3978_v44 = vld [vmem:[#allocation5 + $0xb84] ss:$24 sps:$4 sm:$0xff]  }
 0x198   :  { %2893 = vmatpush1.bf16.msra.mxu0 %v3916_v53  ;;  %2730 = vmatprep.subr.bf16.mxu1 %v3921_v45  ;;  %v3973_v53 = vld [vmem:[#allocation5 + $0xb78] ss:$24 sps:$4 sm:$0xff]  }
 0x199   :  { %2894 = vmatprep.subr.bf16.mxu0 %v3924_v46  ;;  %v3976_v45 = vld [vmem:[#allocation5 + $0xb80] ss:$24 sps:$4 sm:$0xff]   ;;  %v3981_v46 = vld [vmem:[#allocation5 + $0xbac] ss:$24 sps:$4 sm:$0xff]  }
 0x19b   :  { %2731 = vmatpush1.bf16.msra.mxu1 %v3919_v49  ;;  %v3982_v49 = vld [vmem:[#allocation5 + $0xbb0] ss:$24 sps:$4 sm:$0xff]  }
 0x19c   :  { %2895 = vmatpush1.bf16.msra.mxu0 %v3922_v50  ;;  %2732 = vmatprep.subr.bf16.mxu1 %v3927_v52  ;;  %v3987_v50 = vld [vmem:[#allocation5 + $0xbdc] ss:$24 sps:$4 sm:$0xff]  }
 0x19d   :  { %2896 = vmatprep.subr.bf16.mxu0 %v3930_v54  ;;  %v2510_v61 = vpop.f32.mrb[0].mxu1  ;;  %v3990_v52 = vld [vmem:[#allocation5 + $0xbe4] ss:$24 sps:$4 sm:$0xff]   ;;  %v3985_v54 = vld [vmem:[#allocation5 + $0xbd8] ss:$24 sps:$4 sm:$0xff]  }
 0x19e   :  { %v2592_v62 = vpop.f32.mrb[0].mxu0  ;;  %v3360_v63 = vadd.f32 %v2510_v61, %v460_v55  ;;  %v2512_v0 = vpop.f32.mrb[1].mxu1  ;;  %v3988_v55 = vld [vmem:[#allocation5 + $0xbe0] ss:$24 sps:$4 sm:$0xff]  }
 0x19f   :  { %v2594_v1 = vpop.f32.mrb[1].mxu0  ;;  %v3362_v2 = vadd.f32 %v2512_v0, %v464_v56  ;;  %v2514_v3 = vpop.f32.mrb[2].mxu1  ;;  %2733 = vmatpush1.bf16.msra.mxu1 %v3925_v57  ;;  %v467_v56 = vsub.s32 2, %v4251_v43  ;;  %v475_v57 = vsub.s32 4, %v4251_v43 }
 0x1a0   :  { %v2596_v4 = vpop.f32.mrb[2].mxu0  ;;  %2897 = vmatpush1.bf16.msra.mxu0 %v3928_v58  ;;  %v3361_v9 = vadd.f32 %v3360_v63, %v2592_v62  ;;  %v2515_v10 = vpop.f32.mrb[3].mxu1  ;;  %2734 = vmatprep.subr.bf16.mxu1 %v3933_v59  ;;  %v471_v58 = vsub.s32 3, %v4251_v43  ;;  %v479_v59 = vsub.s32 5, %v4251_v43 }
 0x1a1   :  { %v2597_v11 = vpop.f32.mrb[3].mxu0  ;;  %2898 = vmatprep.subr.bf16.mxu0 %v3936_v60  ;;  %v3363_v14 = vadd.f32 %v3362_v2, %v2594_v1  ;;  %v468_v60 = vrot.slane %v4255_v51, %v467_v56  ;;  %v476_v61 = vrot.slane %v4255_v51, %v475_v57 }
 0x1a2   :  { %3991 = vtanh.f32 %v3361_v9  ;;  %v472_v62 = vrot.slane %v4255_v51, %v471_v58  ;;  %v480_v63 = vrot.slane %v4255_v51, %v479_v59  ;;  %v2936_v51 = vld [vmem:[#allocation8 + $0x18] sm:$0xff] }
 0x1a3   :  { %3993 = vtanh.f32 %v3363_v14  ;;  %2735 = vmatpush1.bf16.msra.mxu1 %v3931_v5 }
 0x1a4   :  { %2899 = vmatpush1.bf16.msra.mxu0 %v3934_v8  ;;  %2736 = vmatprep.subr.bf16.mxu1 %v3939_v12  ;;  %v2935_v12 = vld [vmem:[#allocation8 + $0x10] sm:$0xff] }
 0x1a5   :  { %2900 = vmatprep.subr.bf16.mxu0 %v3942_v13  ;;  %v2937_v13 = vld [vmem:[#allocation8 + $0x20] sm:$0xff] }
 0x1a7   :  { %2737 = vmatpush1.bf16.msra.mxu1 %v3937_v15 }
 0x1a8   :  { %2901 = vmatpush1.bf16.msra.mxu0 %v3940_v18  ;;  %2738 = vmatprep.subr.bf16.mxu1 %v3945_v19  ;;  %v2938_v19 = vld [vmem:[#allocation8 + $0x28] sm:$0xff] }
 0x1a9   :  { %2902 = vmatprep.subr.bf16.mxu0 %v3948_v20 }
 0x1ab   :  { %2739 = vmatpush1.bf16.msra.mxu1 %v3943_v21 }
 0x1ac   :  { %2903 = vmatpush1.bf16.msra.mxu0 %v3946_v22  ;;  %v3992_v29 = vpop.eup %3991  ;;  %2740 = vmatprep.subr.bf16.mxu1 %v3951_v23 }
 0x1ad   :  { %2904 = vmatprep.subr.bf16.mxu0 %v3954_v24  ;;  %v3994_v32 = vpop.eup %3993  ;;  %v2939_v33 = vmul.f32 %v3992_v29, %v2933_v25 }
 0x1ae   :  { %v2940_v34 = vmul.f32 %v3994_v32, %v2934_v26 }
 0x1af   :  { %2945 = vst [vmem:[#allocation10] sm:$0xff] %v2939_v33  ;;  %2741 = vmatpush1.bf16.msra.mxu1 %v3949_v27 }
 0x1b0   :  { %2905 = vmatpush1.bf16.msra.mxu0 %v3952_v28  ;;  %2946 = vst [vmem:[#allocation10 + $0x8] sm:$0xff] %v2940_v34  ;;  %2742 = vmatprep.subr.bf16.mxu1 %v3957_v30 }
 0x1b1   :  { %2906 = vmatprep.subr.bf16.mxu0 %v3960_v31 }
 0x1b3   :  { %2743 = vmatpush1.bf16.msra.mxu1 %v3955_v35 }
 0x1b4   :  { %2907 = vmatpush1.bf16.msra.mxu0 %v3958_v6  ;;  %2744 = vmatprep.subr.bf16.mxu1 %v3963_v48 }
 0x1b5   :  { %2908 = vmatprep.subr.bf16.mxu0 %v3966_v38 }
 0x1b7   :  { %2745 = vmatpush1.bf16.msra.mxu1 %v3961_v39 }
 0x1b8   :  { %2909 = vmatpush1.bf16.msra.mxu0 %v3964_v40  ;;  %2746 = vmatprep.subr.bf16.mxu1 %v3969_v16 }
 0x1b9   :  { %2910 = vmatprep.subr.bf16.mxu0 %v3972_v41 }
 0x1bb   :  { %2747 = vmatpush1.bf16.msra.mxu1 %v3967_v42 }
 0x1bc   :  { %2911 = vmatpush1.bf16.msra.mxu0 %v3970_v7  ;;  %2748 = vmatprep.subr.bf16.mxu1 %v3975_v36 }
 0x1bd   :  { %2912 = vmatprep.subr.bf16.mxu0 %v3978_v44 }
 0x1bf   :  { %2749 = vmatpush1.bf16.msra.mxu1 %v3973_v53 }
 0x1c0   :  { %2913 = vmatpush1.bf16.msra.mxu0 %v3976_v45  ;;  %2750 = vmatprep.subr.bf16.mxu1 %v3981_v46 }
 0x1c1   :  { %2914 = vmatprep.subr.bf16.mxu0 %v3984_v37 }
 0x1c3   :  { %2751 = vmatpush1.bf16.msra.mxu1 %v3979_v47 }
 0x1c4   :  { %2915 = vmatpush1.bf16.msra.mxu0 %v3982_v49  ;;  %2752 = vmatprep.subr.bf16.mxu1 %v3987_v50 }
 0x1c5   :  { %2916 = vmatprep.subr.bf16.mxu0 %v3990_v52 }
 0x1c7   :  { %2753 = vmatpush1.bf16.msra.mxu1 %v3985_v54 }
 0x1c8   :  { %2917 = vmatpush1.bf16.msra.mxu0 %v3988_v55 }
 0x1ca   :  { %2755 = vmatmul.mubr.bf16.vlgmr.msra.gmra.mrb[4].mxu1 %v4233_v17 }
 0x1cb   :  { %2919 = vmatmul.mubr.bf16.vlgmr.msra.gmra.mrb[4].mxu0 %v4233_v17 }
 0x29d   :  { %v2756_v0 = vpop.f32.mrb[4].mxu1 }
 0x29e   :  { %v2920_v1 = vpop.f32.mrb[4].mxu0  ;;  %v3364_v2 = vadd.f32 %v2756_v0, %v468_v60  ;;  %v2758_v3 = vpop.f32.mrb[5].mxu1 }
 0x29f   :  { %v3366_v17 = vadd.f32 %v2920_v1, %v476_v61  ;;  %v2922_v4 = vpop.f32.mrb[5].mxu0  ;;  %v3365_v5 = vadd.f32 %v2758_v3, %v472_v62  ;;  %v2760_v9 = vpop.f32.mrb[6].mxu1 }
 0x2a0   :  { %v3367_v8 = vadd.f32 %v2922_v4, %v480_v63  ;;  %v2924_v10 = vpop.f32.mrb[6].mxu0  ;;  %3995 = vtanh.f32 %v3364_v2  ;;  %v2761_v43 = vpop.f32.mrb[7].mxu1 }
 0x2a1   :  { %v2925_v11 = vpop.f32.mrb[7].mxu0  ;;  %3997 = vtanh.f32 %v3366_v17 }
 0x2a2   :  { %3999 = vtanh.f32 %v3365_v5 }
 0x2a3   :  { %4001 = vtanh.f32 %v3367_v8 }
 0x2aa   :  { %v3996_v14 = vpop.eup %3995 }
 0x2ab   :  { %v3998_v15 = vpop.eup %3997  ;;  %v2941_v18 = vmul.f32 %v3996_v14, %v2935_v12 }
 0x2ac   :  { %v4000_v20 = vpop.eup %3999  ;;  %v2943_v21 = vmul.f32 %v3998_v15, %v2937_v13 }
 0x2ad   :  { %v4002_v22 = vpop.eup %4001  ;;  %2947 = vst [vmem:[#allocation10 + $0x10] sm:$0xff] %v2941_v18  ;;  %v2942_v23 = vmul.f32 %v4000_v20, %v2936_v51 }
 0x2ae   :  { %2949 = vst [vmem:[#allocation10 + $0x20] sm:$0xff] %v2943_v21  ;;  %v2944_v24 = vmul.f32 %v4002_v22, %v2938_v19 }
 0x2af   :  { %2948 = vst [vmem:[#allocation10 + $0x18] sm:$0xff] %v2942_v23 }
 0x2b0   :  { %2950 = vst [vmem:[#allocation10 + $0x28] sm:$0xff] %v2944_v24 }
 0x2b1   :  { %4102 = shalt.err (!%p4099_p8)
}
 0x2b2   :  { %s4103_s1 = scalar_lea.hbm %s4285_s4, 768 }
 0x2b3   :  { %p4104_p9 = scmp.ne.s32.totalorder %s4285_s4, %s4103_s1  ;;  %p4107_p10 = scmp.lt.u32.totalorder %s4103_s1, %s4285_s4 }
 0x2b5   :  { %p4109_p11 = pnand %p4107_p10, %p4104_p9 }
 0x2b7   :  { %4112 = shalt.err (!%p4109_p11)
}
 0x2b8   :  { %2960 = dma.vmem_to_hbm [thread:$0]  %s2958_s10, 768, %s4285_s4, [#allocation4]  }
 0x2b9   :  { %4119 = dma.done.wait [#allocation4], 768  }
 0x2ba   :  { %4120 = vsyncadd [#allocation4], 4294966528 }
 0x2bb   :  { %2964 = vsyncpa [#allocation3], 1 }
 0x2bc   :  { %2965 = vsyncpa [#allocation6], 1 }
 0x2bd   :  { %2966 = vsyncpa [#allocation9], 1 }
 0x2be   :  { %2967 = vsyncpa [#allocation4], 1 }

</bundles_post_ra>
